<compile_context>
chip_gen: v6e
topology: v6e:2x2x1
jax: 0.10.0
libtpu: 0.0.40
codegen_flags: <defaults>
</compile_context>

<pallas_src>
import jax
import jax.numpy as jnp
from jax.experimental import pallas as pl
from jax.experimental.pallas import tpu as pltpu


def _make_rnn_kernel(num_layers, seq_len, batch_pad, hidden_dim, num_policies, input_size):
    S, BP, H, P, I = seq_len, batch_pad, hidden_dim, num_policies, input_size

    def kernel(x_ref, *refs):
        # refs layout: [w_ihT, w_hhT, bias] * num_layers, fc_wT, fc_b,
        #              out_ref, proj_ref, hid_ref
        layer_refs = refs[: 3 * num_layers]
        fc_wT_ref, fc_b_ref, out_ref, proj_ref, hid_ref = refs[3 * num_layers:]

        # (BP, S, I) batch-first -> time-major flat (S*BP, I); done once per call.
        inp_all = jnp.transpose(x_ref[...], (1, 0, 2)).reshape(S * BP, I)

        for layer in range(num_layers):
            w_ihT = layer_refs[3 * layer + 0][...]   # (in_l, H) pre-transposed
            w_hhT = layer_refs[3 * layer + 1][...]   # (H, H)    pre-transposed
            bias = layer_refs[3 * layer + 2][...]    # (1, H) = b_ih + b_hh

            # Hoisted input projection: one tall MXU matmul over all timesteps.
            proj_ref[...] = (
                jnp.dot(inp_all, w_ihT, preferred_element_type=jnp.float32) + bias)

            # Serial recurrence over time: only h @ W_hh^T + tanh on the critical path.
            def step(t, h_prev, w_hhT=w_hhT):
                row = pl.multiple_of(t * BP, BP)     # tile-aligned sublane slice
                pre = proj_ref[pl.ds(row, BP), :] + jnp.dot(
                    h_prev, w_hhT, preferred_element_type=jnp.float32)
                h_new = jnp.tanh(pre)
                hid_ref[pl.ds(row, BP), :] = h_new
                return h_new

            jax.lax.fori_loop(0, S, step,
                              jnp.zeros((BP, H), jnp.float32), unroll=True)

            inp_all = hid_ref[...]   # (S*BP, H): becomes input to the next layer

        # fc + sigmoid hoisted out of the time loop; reorder to batch-major so the
        # flat output matches output.contiguous().view(-1, H) of the batch-first RNN.
        h_bm = jnp.transpose(inp_all.reshape(S, BP, H), (1, 0, 2)).reshape(BP * S, H)
        logits = (jnp.dot(h_bm, fc_wT_ref[...], preferred_element_type=jnp.float32)
                  + fc_b_ref[...])
        out_ref[...] = jax.nn.sigmoid(logits).reshape(BP, S, P)

    return kernel


def rl_rnn_forward(x_bsi, params):
    """x_bsi: (B, S, input_size) float32, batch_first like the PyTorch module."""
    num_layers = len(params["layers"])
    hidden_dim = params["fc_w"].shape[1]
    num_policies = params["fc_w"].shape[0]

    B, S, I = x_bsi.shape
    BP = ((B + 7) // 8) * 8                       # pad batch to 8-sublane multiple
    x_pad = jnp.pad(x_bsi, ((0, BP - B), (0, 0), (0, 0))) if BP != B else x_bsi

    # Pre-transpose weights and fold the two RNN biases once, wrapper-side.
    weight_args, weight_specs = [], []
    for (w_ih, w_hh, b_ih, b_hh) in params["layers"]:
        w_ihT = w_ih.T                             # (in_l, H)
        w_hhT = w_hh.T                             # (H, H)
        bias = (b_ih + b_hh).reshape(1, -1)        # (1, H)
        for w in (w_ihT, w_hhT, bias):
            weight_args.append(w)
            weight_specs.append(pl.BlockSpec(w.shape, lambda i: (0, 0)))
    fc_wT = params["fc_w"].T                       # (H, P)
    fc_b = params["fc_b"].reshape(1, -1)           # (1, P)
    weight_args += [fc_wT, fc_b]
    weight_specs += [pl.BlockSpec(fc_wT.shape, lambda i: (0, 0)),
                     pl.BlockSpec(fc_b.shape, lambda i: (0, 0))]

    kernel = _make_rnn_kernel(num_layers, S, BP, hidden_dim, num_policies, I)

    out_bsp = pl.pallas_call(
        kernel,
        out_shape=jax.ShapeDtypeStruct((BP, S, num_policies), jnp.float32),
        grid_spec=pltpu.PrefetchScalarGridSpec(
            num_scalar_prefetch=0,
            grid=(1,),   # single invocation: everything resident in VMEM
            in_specs=[pl.BlockSpec((BP, S, I), lambda i: (0, 0, 0))] + weight_specs,
            out_specs=pl.BlockSpec((BP, S, num_policies), lambda i: (0, 0, 0)),
            scratch_shapes=[
                pltpu.VMEM((S * BP, hidden_dim), jnp.float32),   # proj_ref
                pltpu.VMEM((S * BP, hidden_dim), jnp.float32),   # hid_ref
            ],
        ),
        compiler_params=pltpu.CompilerParams(
            dimension_semantics=("arbitrary",)),
    )(x_pad, *weight_args)

    # drop padded batch rows; (B, S, P) -> (B*S, P) matches view(-1, H)->fc->sigmoid
    return out_bsp[:B].reshape(B * S, num_policies)


def init_params(key, num_policies, num_layers, hidden_dim):
    """Deterministic init mirroring nn.RNN / nn.Linear uniform(-1/sqrt(H), 1/sqrt(H))."""
    input_size = num_policies * 2
    k = 1.0 / jnp.sqrt(jnp.float32(hidden_dim))
    layers = []
    for layer in range(num_layers):
        in_l = input_size if layer == 0 else hidden_dim
        key, k1, k2, k3, k4 = jax.random.split(key, 5)
        w_ih = jax.random.uniform(k1, (hidden_dim, in_l), jnp.float32, -k, k)
        w_hh = jax.random.uniform(k2, (hidden_dim, hidden_dim), jnp.float32, -k, k)
        b_ih = jax.random.uniform(k3, (hidden_dim,), jnp.float32, -k, k)
        b_hh = jax.random.uniform(k4, (hidden_dim,), jnp.float32, -k, k)
        layers.append((w_ih, w_hh, b_ih, b_hh))
    key, k1, k2 = jax.random.split(key, 3)
    fc_w = jax.random.uniform(k1, (num_policies, hidden_dim), jnp.float32, -k, k)
    fc_b = jax.random.uniform(k2, (num_policies,), jnp.float32, -k, k)
    return {"layers": layers, "fc_w": fc_w, "fc_b": fc_b}


def rl_rnn_reference(x_bsi, params):
    """Pure-JAX reference of the PyTorch forward (for correctness check)."""
    num_layers = len(params["layers"])
    hidden_dim = params["fc_w"].shape[1]
    B, S, _ = x_bsi.shape
    h = [jnp.zeros((B, hidden_dim), jnp.float32) for _ in range(num_layers)]
    outs = []
    for t in range(S):
        inp = x_bsi[:, t]
        for layer in range(num_layers):
            w_ih, w_hh, b_ih, b_hh = params["layers"][layer]
            h[layer] = jnp.tanh(inp @ w_ih.T + b_ih + h[layer] @ w_hh.T + b_hh)
            inp = h[layer]
        outs.append(inp)
    rnn_out = jnp.stack(outs, axis=1).reshape(-1, hidden_dim)   # (B*S, H)
    return jax.nn.sigmoid(rnn_out @ params["fc_w"].T + params["fc_b"])


if __name__ == "__main__":
    num_policies = 4        # -> input_size = 8, output_size = 4
    num_layers = 2
    hidden_dim = 32
    batch, seq = 2, 8

    key = jax.random.PRNGKey(0)
    key, pkey, xkey = jax.random.split(key, 3)
    params = init_params(pkey, num_policies, num_layers, hidden_dim)
    x = jax.random.normal(xkey, (batch, seq, num_policies * 2), jnp.float32)

    out = jax.block_until_ready(rl_rnn_forward(x, params))
    ref = rl_rnn_reference(x, params)

    assert out.shape == (batch * seq, num_policies), out.shape
    assert jnp.allclose(out, ref, atol=1e-5, rtol=1e-5), \
        f"max err {jnp.max(jnp.abs(out - ref))}"
    print("KERNEL_OK")
</pallas_src>

<mosaic_0001>
module attributes {stable_mosaic.version = 11 : i64} {
  func.func @kernel(%arg0: i32, %arg1: memref<8x8x8xf32, #tpu.memory_space<vmem>>, %arg2: memref<8x32xf32, #tpu.memory_space<vmem>>, %arg3: memref<32x32xf32, #tpu.memory_space<vmem>>, %arg4: memref<1x32xf32, #tpu.memory_space<vmem>>, %arg5: memref<32x32xf32, #tpu.memory_space<vmem>>, %arg6: memref<32x32xf32, #tpu.memory_space<vmem>>, %arg7: memref<1x32xf32, #tpu.memory_space<vmem>>, %arg8: memref<32x4xf32, #tpu.memory_space<vmem>>, %arg9: memref<1x4xf32, #tpu.memory_space<vmem>>, %arg10: memref<8x8x4xf32, #tpu.memory_space<vmem>>, %arg11: memref<64x32xf32, #tpu.memory_space<vmem>>, %arg12: memref<64x32xf32, #tpu.memory_space<vmem>>) attributes {dimension_semantics = [#tpu.dimension_semantics<arbitrary>], iteration_bounds = array<i64: 1>, scalar_prefetch = 0 : i64, scratch_operands = 2 : i64, tpu.core_type = #tpu.core_type<tc>, window_params = [{pipeline_mode = #tpu.pipeline_mode<synchronous>, transform_indices = @transform_0, window_bounds = array<i64: 8, 8, 8>}, {pipeline_mode = #tpu.pipeline_mode<synchronous>, transform_indices = @transform_1, window_bounds = array<i64: 8, 32>}, {pipeline_mode = #tpu.pipeline_mode<synchronous>, transform_indices = @transform_2, window_bounds = array<i64: 32, 32>}, {pipeline_mode = #tpu.pipeline_mode<synchronous>, transform_indices = @transform_3, window_bounds = array<i64: 1, 32>}, {pipeline_mode = #tpu.pipeline_mode<synchronous>, transform_indices = @transform_4, window_bounds = array<i64: 32, 32>}, {pipeline_mode = #tpu.pipeline_mode<synchronous>, transform_indices = @transform_5, window_bounds = array<i64: 32, 32>}, {pipeline_mode = #tpu.pipeline_mode<synchronous>, transform_indices = @transform_6, window_bounds = array<i64: 1, 32>}, {pipeline_mode = #tpu.pipeline_mode<synchronous>, transform_indices = @transform_7, window_bounds = array<i64: 32, 4>}, {pipeline_mode = #tpu.pipeline_mode<synchronous>, transform_indices = @transform_8, window_bounds = array<i64: 1, 4>}, {pipeline_mode = #tpu.pipeline_mode<synchronous>, transform_indices = @transform_9, window_bounds = array<i64: 8, 8, 4>}]} {
    %c0 = arith.constant 0 : index
    %c0_0 = arith.constant 0 : index
    %c0_1 = arith.constant 0 : index
    %0 = vector.load %arg1[%c0, %c0_0, %c0_1] : memref<8x8x8xf32, #tpu.memory_space<vmem>>, vector<8x8x8xf32>
    %1 = tpu.transpose %0, [1, 0, 2] : vector<8x8x8xf32> -> vector<8x8x8xf32>
    %2 = vector.shape_cast %1 : vector<8x8x8xf32> to vector<64x8xf32>
    %c0_2 = arith.constant 0 : index
    %c0_3 = arith.constant 0 : index
    %3 = vector.load %arg2[%c0_2, %c0_3] : memref<8x32xf32, #tpu.memory_space<vmem>>, vector<8x32xf32>
    %c0_4 = arith.constant 0 : index
    %c0_5 = arith.constant 0 : index
    %4 = vector.load %arg3[%c0_4, %c0_5] : memref<32x32xf32, #tpu.memory_space<vmem>>, vector<32x32xf32>
    %c0_6 = arith.constant 0 : index
    %c0_7 = arith.constant 0 : index
    %5 = vector.load %arg4[%c0_6, %c0_7] : memref<1x32xf32, #tpu.memory_space<vmem>>, vector<1x32xf32>
    %cst = arith.constant dense<0.000000e+00> : vector<64x32xf32>
    %6 = tpu.matmul %2, %3, %cst {dimension_numbers = #tpu.dot_dimension_numbers<[1], [0], [0], [1], [0, 0, 1, 1], [], []>} : vector<64x8xf32>, vector<8x32xf32>, vector<64x32xf32> -> vector<64x32xf32>
    %7 = vector.broadcast %5 : vector<1x32xf32> to vector<64x32xf32>
    %8 = arith.addf %6, %7 : vector<64x32xf32>
    %c0_8 = arith.constant 0 : index
    %c0_9 = arith.constant 0 : index
    %9 = vector.load %arg11[%c0_8, %c0_9] : memref<64x32xf32, #tpu.memory_space<vmem>>, vector<64x32xf32>
    tpu.vector_store %arg11[%c0_8, %c0_9], %8 {strides = array<i32>} : memref<64x32xf32, #tpu.memory_space<vmem>>, vector<64x32xf32>,
    %cst_10 = arith.constant 0.000000e+00 : f32
    %10 = vector.broadcast %cst_10 : f32 to vector<8x32xf32>
    %c0_i32 = arith.constant 0 : i32
    %c8_i32 = arith.constant 8 : i32
    %11 = arith.muli %c0_i32, %c8_i32 : i32
    %12 = tpu.assume_multiple %11, 8 : i32
    %13 = arith.index_cast %12 : i32 to index
    %c0_11 = arith.constant 0 : index
    %14 = vector.load %arg11[%13, %c0_11] : memref<64x32xf32, #tpu.memory_space<vmem>>, vector<8x32xf32>
    %cst_12 = arith.constant dense<0.000000e+00> : vector<8x32xf32>
    %15 = tpu.matmul %10, %4, %cst_12 {dimension_numbers = #tpu.dot_dimension_numbers<[1], [0], [0], [1], [0, 0, 1, 1], [], []>} : vector<8x32xf32>, vector<32x32xf32>, vector<8x32xf32> -> vector<8x32xf32>
    %16 = arith.addf %14, %15 : vector<8x32xf32>
    %17 = math.tanh %16 : vector<8x32xf32>
    %18 = arith.index_cast %12 : i32 to index
    %c0_13 = arith.constant 0 : index
    %19 = vector.load %arg12[%18, %c0_13] : memref<64x32xf32, #tpu.memory_space<vmem>>, vector<8x32xf32>
    tpu.vector_store %arg12[%18, %c0_13], %17 {strides = array<i32>} : memref<64x32xf32, #tpu.memory_space<vmem>>, vector<8x32xf32>,
    %c1_i32 = arith.constant 1 : i32
    %c8_i32_14 = arith.constant 8 : i32
    %20 = arith.muli %c1_i32, %c8_i32_14 : i32
    %21 = tpu.assume_multiple %20, 8 : i32
    %22 = arith.index_cast %21 : i32 to index
    %c0_15 = arith.constant 0 : index
    %23 = vector.load %arg11[%22, %c0_15] : memref<64x32xf32, #tpu.memory_space<vmem>>, vector<8x32xf32>
    %cst_16 = arith.constant dense<0.000000e+00> : vector<8x32xf32>
    %24 = tpu.matmul %17, %4, %cst_16 {dimension_numbers = #tpu.dot_dimension_numbers<[1], [0], [0], [1], [0, 0, 1, 1], [], []>} : vector<8x32xf32>, vector<32x32xf32>, vector<8x32xf32> -> vector<8x32xf32>
    %25 = arith.addf %23, %24 : vector<8x32xf32>
    %26 = math.tanh %25 : vector<8x32xf32>
    %27 = arith.index_cast %21 : i32 to index
    %c0_17 = arith.constant 0 : index
    %28 = vector.load %arg12[%27, %c0_17] : memref<64x32xf32, #tpu.memory_space<vmem>>, vector<8x32xf32>
    tpu.vector_store %arg12[%27, %c0_17], %26 {strides = array<i32>} : memref<64x32xf32, #tpu.memory_space<vmem>>, vector<8x32xf32>,
    %c2_i32 = arith.constant 2 : i32
    %c8_i32_18 = arith.constant 8 : i32
    %29 = arith.muli %c2_i32, %c8_i32_18 : i32
    %30 = tpu.assume_multiple %29, 8 : i32
    %31 = arith.index_cast %30 : i32 to index
    %c0_19 = arith.constant 0 : index
    %32 = vector.load %arg11[%31, %c0_19] : memref<64x32xf32, #tpu.memory_space<vmem>>, vector<8x32xf32>
    %cst_20 = arith.constant dense<0.000000e+00> : vector<8x32xf32>
    %33 = tpu.matmul %26, %4, %cst_20 {dimension_numbers = #tpu.dot_dimension_numbers<[1], [0], [0], [1], [0, 0, 1, 1], [], []>} : vector<8x32xf32>, vector<32x32xf32>, vector<8x32xf32> -> vector<8x32xf32>
    %34 = arith.addf %32, %33 : vector<8x32xf32>
    %35 = math.tanh %34 : vector<8x32xf32>
    %36 = arith.index_cast %30 : i32 to index
    %c0_21 = arith.constant 0 : index
    %37 = vector.load %arg12[%36, %c0_21] : memref<64x32xf32, #tpu.memory_space<vmem>>, vector<8x32xf32>
    tpu.vector_store %arg12[%36, %c0_21], %35 {strides = array<i32>} : memref<64x32xf32, #tpu.memory_space<vmem>>, vector<8x32xf32>,
    %c3_i32 = arith.constant 3 : i32
    %c8_i32_22 = arith.constant 8 : i32
    %38 = arith.muli %c3_i32, %c8_i32_22 : i32
    %39 = tpu.assume_multiple %38, 8 : i32
    %40 = arith.index_cast %39 : i32 to index
    %c0_23 = arith.constant 0 : index
    %41 = vector.load %arg11[%40, %c0_23] : memref<64x32xf32, #tpu.memory_space<vmem>>, vector<8x32xf32>
    %cst_24 = arith.constant dense<0.000000e+00> : vector<8x32xf32>
    %42 = tpu.matmul %35, %4, %cst_24 {dimension_numbers = #tpu.dot_dimension_numbers<[1], [0], [0], [1], [0, 0, 1, 1], [], []>} : vector<8x32xf32>, vector<32x32xf32>, vector<8x32xf32> -> vector<8x32xf32>
    %43 = arith.addf %41, %42 : vector<8x32xf32>
    %44 = math.tanh %43 : vector<8x32xf32>
    %45 = arith.index_cast %39 : i32 to index
    %c0_25 = arith.constant 0 : index
    %46 = vector.load %arg12[%45, %c0_25] : memref<64x32xf32, #tpu.memory_space<vmem>>, vector<8x32xf32>
    tpu.vector_store %arg12[%45, %c0_25], %44 {strides = array<i32>} : memref<64x32xf32, #tpu.memory_space<vmem>>, vector<8x32xf32>,
    %c4_i32 = arith.constant 4 : i32
    %c8_i32_26 = arith.constant 8 : i32
    %47 = arith.muli %c4_i32, %c8_i32_26 : i32
    %48 = tpu.assume_multiple %47, 8 : i32
    %49 = arith.index_cast %48 : i32 to index
    %c0_27 = arith.constant 0 : index
    %50 = vector.load %arg11[%49, %c0_27] : memref<64x32xf32, #tpu.memory_space<vmem>>, vector<8x32xf32>
    %cst_28 = arith.constant dense<0.000000e+00> : vector<8x32xf32>
    %51 = tpu.matmul %44, %4, %cst_28 {dimension_numbers = #tpu.dot_dimension_numbers<[1], [0], [0], [1], [0, 0, 1, 1], [], []>} : vector<8x32xf32>, vector<32x32xf32>, vector<8x32xf32> -> vector<8x32xf32>
    %52 = arith.addf %50, %51 : vector<8x32xf32>
    %53 = math.tanh %52 : vector<8x32xf32>
    %54 = arith.index_cast %48 : i32 to index
    %c0_29 = arith.constant 0 : index
    %55 = vector.load %arg12[%54, %c0_29] : memref<64x32xf32, #tpu.memory_space<vmem>>, vector<8x32xf32>
    tpu.vector_store %arg12[%54, %c0_29], %53 {strides = array<i32>} : memref<64x32xf32, #tpu.memory_space<vmem>>, vector<8x32xf32>,
    %c5_i32 = arith.constant 5 : i32
    %c8_i32_30 = arith.constant 8 : i32
    %56 = arith.muli %c5_i32, %c8_i32_30 : i32
    %57 = tpu.assume_multiple %56, 8 : i32
    %58 = arith.index_cast %57 : i32 to index
    %c0_31 = arith.constant 0 : index
    %59 = vector.load %arg11[%58, %c0_31] : memref<64x32xf32, #tpu.memory_space<vmem>>, vector<8x32xf32>
    %cst_32 = arith.constant dense<0.000000e+00> : vector<8x32xf32>
    %60 = tpu.matmul %53, %4, %cst_32 {dimension_numbers = #tpu.dot_dimension_numbers<[1], [0], [0], [1], [0, 0, 1, 1], [], []>} : vector<8x32xf32>, vector<32x32xf32>, vector<8x32xf32> -> vector<8x32xf32>
    %61 = arith.addf %59, %60 : vector<8x32xf32>
    %62 = math.tanh %61 : vector<8x32xf32>
    %63 = arith.index_cast %57 : i32 to index
    %c0_33 = arith.constant 0 : index
    %64 = vector.load %arg12[%63, %c0_33] : memref<64x32xf32, #tpu.memory_space<vmem>>, vector<8x32xf32>
    tpu.vector_store %arg12[%63, %c0_33], %62 {strides = array<i32>} : memref<64x32xf32, #tpu.memory_space<vmem>>, vector<8x32xf32>,
    %c6_i32 = arith.constant 6 : i32
    %c8_i32_34 = arith.constant 8 : i32
    %65 = arith.muli %c6_i32, %c8_i32_34 : i32
    %66 = tpu.assume_multiple %65, 8 : i32
    %67 = arith.index_cast %66 : i32 to index
    %c0_35 = arith.constant 0 : index
    %68 = vector.load %arg11[%67, %c0_35] : memref<64x32xf32, #tpu.memory_space<vmem>>, vector<8x32xf32>
    %cst_36 = arith.constant dense<0.000000e+00> : vector<8x32xf32>
    %69 = tpu.matmul %62, %4, %cst_36 {dimension_numbers = #tpu.dot_dimension_numbers<[1], [0], [0], [1], [0, 0, 1, 1], [], []>} : vector<8x32xf32>, vector<32x32xf32>, vector<8x32xf32> -> vector<8x32xf32>
    %70 = arith.addf %68, %69 : vector<8x32xf32>
    %71 = math.tanh %70 : vector<8x32xf32>
    %72 = arith.index_cast %66 : i32 to index
    %c0_37 = arith.constant 0 : index
    %73 = vector.load %arg12[%72, %c0_37] : memref<64x32xf32, #tpu.memory_space<vmem>>, vector<8x32xf32>
    tpu.vector_store %arg12[%72, %c0_37], %71 {strides = array<i32>} : memref<64x32xf32, #tpu.memory_space<vmem>>, vector<8x32xf32>,
    %c7_i32 = arith.constant 7 : i32
    %c8_i32_38 = arith.constant 8 : i32
    %74 = arith.muli %c7_i32, %c8_i32_38 : i32
    %75 = tpu.assume_multiple %74, 8 : i32
    %76 = arith.index_cast %75 : i32 to index
    %c0_39 = arith.constant 0 : index
    %77 = vector.load %arg11[%76, %c0_39] : memref<64x32xf32, #tpu.memory_space<vmem>>, vector<8x32xf32>
    %cst_40 = arith.constant dense<0.000000e+00> : vector<8x32xf32>
    %78 = tpu.matmul %71, %4, %cst_40 {dimension_numbers = #tpu.dot_dimension_numbers<[1], [0], [0], [1], [0, 0, 1, 1], [], []>} : vector<8x32xf32>, vector<32x32xf32>, vector<8x32xf32> -> vector<8x32xf32>
    %79 = arith.addf %77, %78 : vector<8x32xf32>
    %80 = math.tanh %79 : vector<8x32xf32>
    %81 = arith.index_cast %75 : i32 to index
    %c0_41 = arith.constant 0 : index
    %82 = vector.load %arg12[%81, %c0_41] : memref<64x32xf32, #tpu.memory_space<vmem>>, vector<8x32xf32>
    tpu.vector_store %arg12[%81, %c0_41], %80 {strides = array<i32>} : memref<64x32xf32, #tpu.memory_space<vmem>>, vector<8x32xf32>,
    %c8_i32_42 = arith.constant 8 : i32
    %c0_43 = arith.constant 0 : index
    %c0_44 = arith.constant 0 : index
    %83 = vector.load %arg12[%c0_43, %c0_44] : memref<64x32xf32, #tpu.memory_space<vmem>>, vector<64x32xf32>
    %c0_45 = arith.constant 0 : index
    %c0_46 = arith.constant 0 : index
    %84 = vector.load %arg5[%c0_45, %c0_46] : memref<32x32xf32, #tpu.memory_space<vmem>>, vector<32x32xf32>
    %c0_47 = arith.constant 0 : index
    %c0_48 = arith.constant 0 : index
    %85 = vector.load %arg6[%c0_47, %c0_48] : memref<32x32xf32, #tpu.memory_space<vmem>>, vector<32x32xf32>
    %c0_49 = arith.constant 0 : index
    %c0_50 = arith.constant 0 : index
    %86 = vector.load %arg7[%c0_49, %c0_50] : memref<1x32xf32, #tpu.memory_space<vmem>>, vector<1x32xf32>
    %cst_51 = arith.constant dense<0.000000e+00> : vector<64x32xf32>
    %87 = tpu.matmul %83, %84, %cst_51 {dimension_numbers = #tpu.dot_dimension_numbers<[1], [0], [0], [1], [0, 0, 1, 1], [], []>} : vector<64x32xf32>, vector<32x32xf32>, vector<64x32xf32> -> vector<64x32xf32>
    %88 = vector.broadcast %86 : vector<1x32xf32> to vector<64x32xf32>
    %89 = arith.addf %87, %88 : vector<64x32xf32>
    %c0_52 = arith.constant 0 : index
    %c0_53 = arith.constant 0 : index
    %90 = vector.load %arg11[%c0_52, %c0_53] : memref<64x32xf32, #tpu.memory_space<vmem>>, vector<64x32xf32>
    tpu.vector_store %arg11[%c0_52, %c0_53], %89 {strides = array<i32>} : memref<64x32xf32, #tpu.memory_space<vmem>>, vector<64x32xf32>,
    %cst_54 = arith.constant 0.000000e+00 : f32
    %91 = vector.broadcast %cst_54 : f32 to vector<8x32xf32>
    %c0_i32_55 = arith.constant 0 : i32
    %c8_i32_56 = arith.constant 8 : i32
    %92 = arith.muli %c0_i32_55, %c8_i32_56 : i32
    %93 = tpu.assume_multiple %92, 8 : i32
    %94 = arith.index_cast %93 : i32 to index
    %c0_57 = arith.constant 0 : index
    %95 = vector.load %arg11[%94, %c0_57] : memref<64x32xf32, #tpu.memory_space<vmem>>, vector<8x32xf32>
    %cst_58 = arith.constant dense<0.000000e+00> : vector<8x32xf32>
    %96 = tpu.matmul %91, %85, %cst_58 {dimension_numbers = #tpu.dot_dimension_numbers<[1], [0], [0], [1], [0, 0, 1, 1], [], []>} : vector<8x32xf32>, vector<32x32xf32>, vector<8x32xf32> -> vector<8x32xf32>
    %97 = arith.addf %95, %96 : vector<8x32xf32>
    %98 = math.tanh %97 : vector<8x32xf32>
    %99 = arith.index_cast %93 : i32 to index
    %c0_59 = arith.constant 0 : index
    %100 = vector.load %arg12[%99, %c0_59] : memref<64x32xf32, #tpu.memory_space<vmem>>, vector<8x32xf32>
    tpu.vector_store %arg12[%99, %c0_59], %98 {strides = array<i32>} : memref<64x32xf32, #tpu.memory_space<vmem>>, vector<8x32xf32>,
    %c1_i32_60 = arith.constant 1 : i32
    %c8_i32_61 = arith.constant 8 : i32
    %101 = arith.muli %c1_i32_60, %c8_i32_61 : i32
    %102 = tpu.assume_multiple %101, 8 : i32
    %103 = arith.index_cast %102 : i32 to index
    %c0_62 = arith.constant 0 : index
    %104 = vector.load %arg11[%103, %c0_62] : memref<64x32xf32, #tpu.memory_space<vmem>>, vector<8x32xf32>
    %cst_63 = arith.constant dense<0.000000e+00> : vector<8x32xf32>
    %105 = tpu.matmul %98, %85, %cst_63 {dimension_numbers = #tpu.dot_dimension_numbers<[1], [0], [0], [1], [0, 0, 1, 1], [], []>} : vector<8x32xf32>, vector<32x32xf32>, vector<8x32xf32> -> vector<8x32xf32>
    %106 = arith.addf %104, %105 : vector<8x32xf32>
    %107 = math.tanh %106 : vector<8x32xf32>
    %108 = arith.index_cast %102 : i32 to index
    %c0_64 = arith.constant 0 : index
    %109 = vector.load %arg12[%108, %c0_64] : memref<64x32xf32, #tpu.memory_space<vmem>>, vector<8x32xf32>
    tpu.vector_store %arg12[%108, %c0_64], %107 {strides = array<i32>} : memref<64x32xf32, #tpu.memory_space<vmem>>, vector<8x32xf32>,
    %c2_i32_65 = arith.constant 2 : i32
    %c8_i32_66 = arith.constant 8 : i32
    %110 = arith.muli %c2_i32_65, %c8_i32_66 : i32
    %111 = tpu.assume_multiple %110, 8 : i32
    %112 = arith.index_cast %111 : i32 to index
    %c0_67 = arith.constant 0 : index
    %113 = vector.load %arg11[%112, %c0_67] : memref<64x32xf32, #tpu.memory_space<vmem>>, vector<8x32xf32>
    %cst_68 = arith.constant dense<0.000000e+00> : vector<8x32xf32>
    %114 = tpu.matmul %107, %85, %cst_68 {dimension_numbers = #tpu.dot_dimension_numbers<[1], [0], [0], [1], [0, 0, 1, 1], [], []>} : vector<8x32xf32>, vector<32x32xf32>, vector<8x32xf32> -> vector<8x32xf32>
    %115 = arith.addf %113, %114 : vector<8x32xf32>
    %116 = math.tanh %115 : vector<8x32xf32>
    %117 = arith.index_cast %111 : i32 to index
    %c0_69 = arith.constant 0 : index
    %118 = vector.load %arg12[%117, %c0_69] : memref<64x32xf32, #tpu.memory_space<vmem>>, vector<8x32xf32>
    tpu.vector_store %arg12[%117, %c0_69], %116 {strides = array<i32>} : memref<64x32xf32, #tpu.memory_space<vmem>>, vector<8x32xf32>,
    %c3_i32_70 = arith.constant 3 : i32
    %c8_i32_71 = arith.constant 8 : i32
    %119 = arith.muli %c3_i32_70, %c8_i32_71 : i32
    %120 = tpu.assume_multiple %119, 8 : i32
    %121 = arith.index_cast %120 : i32 to index
    %c0_72 = arith.constant 0 : index
    %122 = vector.load %arg11[%121, %c0_72] : memref<64x32xf32, #tpu.memory_space<vmem>>, vector<8x32xf32>
    %cst_73 = arith.constant dense<0.000000e+00> : vector<8x32xf32>
    %123 = tpu.matmul %116, %85, %cst_73 {dimension_numbers = #tpu.dot_dimension_numbers<[1], [0], [0], [1], [0, 0, 1, 1], [], []>} : vector<8x32xf32>, vector<32x32xf32>, vector<8x32xf32> -> vector<8x32xf32>
    %124 = arith.addf %122, %123 : vector<8x32xf32>
    %125 = math.tanh %124 : vector<8x32xf32>
    %126 = arith.index_cast %120 : i32 to index
    %c0_74 = arith.constant 0 : index
    %127 = vector.load %arg12[%126, %c0_74] : memref<64x32xf32, #tpu.memory_space<vmem>>, vector<8x32xf32>
    tpu.vector_store %arg12[%126, %c0_74], %125 {strides = array<i32>} : memref<64x32xf32, #tpu.memory_space<vmem>>, vector<8x32xf32>,
    %c4_i32_75 = arith.constant 4 : i32
    %c8_i32_76 = arith.constant 8 : i32
    %128 = arith.muli %c4_i32_75, %c8_i32_76 : i32
    %129 = tpu.assume_multiple %128, 8 : i32
    %130 = arith.index_cast %129 : i32 to index
    %c0_77 = arith.constant 0 : index
    %131 = vector.load %arg11[%130, %c0_77] : memref<64x32xf32, #tpu.memory_space<vmem>>, vector<8x32xf32>
    %cst_78 = arith.constant dense<0.000000e+00> : vector<8x32xf32>
    %132 = tpu.matmul %125, %85, %cst_78 {dimension_numbers = #tpu.dot_dimension_numbers<[1], [0], [0], [1], [0, 0, 1, 1], [], []>} : vector<8x32xf32>, vector<32x32xf32>, vector<8x32xf32> -> vector<8x32xf32>
    %133 = arith.addf %131, %132 : vector<8x32xf32>
    %134 = math.tanh %133 : vector<8x32xf32>
    %135 = arith.index_cast %129 : i32 to index
    %c0_79 = arith.constant 0 : index
    %136 = vector.load %arg12[%135, %c0_79] : memref<64x32xf32, #tpu.memory_space<vmem>>, vector<8x32xf32>
    tpu.vector_store %arg12[%135, %c0_79], %134 {strides = array<i32>} : memref<64x32xf32, #tpu.memory_space<vmem>>, vector<8x32xf32>,
    %c5_i32_80 = arith.constant 5 : i32
    %c8_i32_81 = arith.constant 8 : i32
    %137 = arith.muli %c5_i32_80, %c8_i32_81 : i32
    %138 = tpu.assume_multiple %137, 8 : i32
    %139 = arith.index_cast %138 : i32 to index
    %c0_82 = arith.constant 0 : index
    %140 = vector.load %arg11[%139, %c0_82] : memref<64x32xf32, #tpu.memory_space<vmem>>, vector<8x32xf32>
    %cst_83 = arith.constant dense<0.000000e+00> : vector<8x32xf32>
    %141 = tpu.matmul %134, %85, %cst_83 {dimension_numbers = #tpu.dot_dimension_numbers<[1], [0], [0], [1], [0, 0, 1, 1], [], []>} : vector<8x32xf32>, vector<32x32xf32>, vector<8x32xf32> -> vector<8x32xf32>
    %142 = arith.addf %140, %141 : vector<8x32xf32>
    %143 = math.tanh %142 : vector<8x32xf32>
    %144 = arith.index_cast %138 : i32 to index
    %c0_84 = arith.constant 0 : index
    %145 = vector.load %arg12[%144, %c0_84] : memref<64x32xf32, #tpu.memory_space<vmem>>, vector<8x32xf32>
    tpu.vector_store %arg12[%144, %c0_84], %143 {strides = array<i32>} : memref<64x32xf32, #tpu.memory_space<vmem>>, vector<8x32xf32>,
    %c6_i32_85 = arith.constant 6 : i32
    %c8_i32_86 = arith.constant 8 : i32
    %146 = arith.muli %c6_i32_85, %c8_i32_86 : i32
    %147 = tpu.assume_multiple %146, 8 : i32
    %148 = arith.index_cast %147 : i32 to index
    %c0_87 = arith.constant 0 : index
    %149 = vector.load %arg11[%148, %c0_87] : memref<64x32xf32, #tpu.memory_space<vmem>>, vector<8x32xf32>
    %cst_88 = arith.constant dense<0.000000e+00> : vector<8x32xf32>
    %150 = tpu.matmul %143, %85, %cst_88 {dimension_numbers = #tpu.dot_dimension_numbers<[1], [0], [0], [1], [0, 0, 1, 1], [], []>} : vector<8x32xf32>, vector<32x32xf32>, vector<8x32xf32> -> vector<8x32xf32>
    %151 = arith.addf %149, %150 : vector<8x32xf32>
    %152 = math.tanh %151 : vector<8x32xf32>
    %153 = arith.index_cast %147 : i32 to index
    %c0_89 = arith.constant 0 : index
    %154 = vector.load %arg12[%153, %c0_89] : memref<64x32xf32, #tpu.memory_space<vmem>>, vector<8x32xf32>
    tpu.vector_store %arg12[%153, %c0_89], %152 {strides = array<i32>} : memref<64x32xf32, #tpu.memory_space<vmem>>, vector<8x32xf32>,
    %c7_i32_90 = arith.constant 7 : i32
    %c8_i32_91 = arith.constant 8 : i32
    %155 = arith.muli %c7_i32_90, %c8_i32_91 : i32
    %156 = tpu.assume_multiple %155, 8 : i32
    %157 = arith.index_cast %156 : i32 to index
    %c0_92 = arith.constant 0 : index
    %158 = vector.load %arg11[%157, %c0_92] : memref<64x32xf32, #tpu.memory_space<vmem>>, vector<8x32xf32>
    %cst_93 = arith.constant dense<0.000000e+00> : vector<8x32xf32>
    %159 = tpu.matmul %152, %85, %cst_93 {dimension_numbers = #tpu.dot_dimension_numbers<[1], [0], [0], [1], [0, 0, 1, 1], [], []>} : vector<8x32xf32>, vector<32x32xf32>, vector<8x32xf32> -> vector<8x32xf32>
    %160 = arith.addf %158, %159 : vector<8x32xf32>
    %161 = math.tanh %160 : vector<8x32xf32>
    %162 = arith.index_cast %156 : i32 to index
    %c0_94 = arith.constant 0 : index
    %163 = vector.load %arg12[%162, %c0_94] : memref<64x32xf32, #tpu.memory_space<vmem>>, vector<8x32xf32>
    tpu.vector_store %arg12[%162, %c0_94], %161 {strides = array<i32>} : memref<64x32xf32, #tpu.memory_space<vmem>>, vector<8x32xf32>,
    %c8_i32_95 = arith.constant 8 : i32
    %c0_96 = arith.constant 0 : index
    %c0_97 = arith.constant 0 : index
    %164 = vector.load %arg12[%c0_96, %c0_97] : memref<64x32xf32, #tpu.memory_space<vmem>>, vector<64x32xf32>
    %165 = vector.shape_cast %164 : vector<64x32xf32> to vector<8x8x32xf32>
    %166 = tpu.transpose %165, [1, 0, 2] : vector<8x8x32xf32> -> vector<8x8x32xf32>
    %167 = vector.shape_cast %166 : vector<8x8x32xf32> to vector<64x32xf32>
    %c0_98 = arith.constant 0 : index
    %c0_99 = arith.constant 0 : index
    %168 = vector.load %arg8[%c0_98, %c0_99] : memref<32x4xf32, #tpu.memory_space<vmem>>, vector<32x4xf32>
    %cst_100 = arith.constant dense<0.000000e+00> : vector<64x4xf32>
    %169 = tpu.matmul %167, %168, %cst_100 {dimension_numbers = #tpu.dot_dimension_numbers<[1], [0], [0], [1], [0, 0, 1, 1], [], []>} : vector<64x32xf32>, vector<32x4xf32>, vector<64x4xf32> -> vector<64x4xf32>
    %c0_101 = arith.constant 0 : index
    %c0_102 = arith.constant 0 : index
    %170 = vector.load %arg9[%c0_101, %c0_102] : memref<1x4xf32, #tpu.memory_space<vmem>>, vector<1x4xf32>
    %171 = vector.broadcast %170 : vector<1x4xf32> to vector<64x4xf32>
    %172 = arith.addf %169, %171 : vector<64x4xf32>
    %173 = arith.negf %172 : vector<64x4xf32>
    %174 = math.exp %173 : vector<64x4xf32>
    %cst_103 = arith.constant 1.000000e+00 : f32
    %175 = vector.broadcast %cst_103 : f32 to vector<64x4xf32>
    %176 = arith.addf %175, %174 : vector<64x4xf32>
    %177 = arith.divf %175, %176 : vector<64x4xf32>
    %178 = vector.shape_cast %177 : vector<64x4xf32> to vector<8x8x4xf32>
    %c0_104 = arith.constant 0 : index
    %c0_105 = arith.constant 0 : index
    %c0_106 = arith.constant 0 : index
    %179 = vector.load %arg10[%c0_104, %c0_105, %c0_106] : memref<8x8x4xf32, #tpu.memory_space<vmem>>, vector<8x8x4xf32>
    tpu.vector_store %arg10[%c0_104, %c0_105, %c0_106], %178 {strides = array<i32>} : memref<8x8x4xf32, #tpu.memory_space<vmem>>, vector<8x8x4xf32>,
    return
  }
  func.func @transform_0(%arg0: i32) -> (i32, i32, i32) {
    %c0_i32 = arith.constant 0 : i32
    %c0_i32_0 = arith.constant 0 : i32
    %c0_i32_1 = arith.constant 0 : i32
    %c0_i32_2 = arith.constant 0 : i32
    return %c0_i32, %c0_i32_0, %c0_i32_1 : i32, i32, i32
  }
  func.func @transform_1(%arg0: i32) -> (i32, i32) {
    %c0_i32 = arith.constant 0 : i32
    %c0_i32_0 = arith.constant 0 : i32
    %c0_i32_1 = arith.constant 0 : i32
    return %c0_i32, %c0_i32_0 : i32, i32
  }
  func.func @transform_2(%arg0: i32) -> (i32, i32) {
    %c0_i32 = arith.constant 0 : i32
    %c0_i32_0 = arith.constant 0 : i32
    %c0_i32_1 = arith.constant 0 : i32
    return %c0_i32, %c0_i32_0 : i32, i32
  }
  func.func @transform_3(%arg0: i32) -> (i32, i32) {
    %c0_i32 = arith.constant 0 : i32
    %c0_i32_0 = arith.constant 0 : i32
    %c0_i32_1 = arith.constant 0 : i32
    return %c0_i32, %c0_i32_0 : i32, i32
  }
  func.func @transform_4(%arg0: i32) -> (i32, i32) {
    %c0_i32 = arith.constant 0 : i32
    %c0_i32_0 = arith.constant 0 : i32
    %c0_i32_1 = arith.constant 0 : i32
    return %c0_i32, %c0_i32_0 : i32, i32
  }
  func.func @transform_5(%arg0: i32) -> (i32, i32) {
    %c0_i32 = arith.constant 0 : i32
    %c0_i32_0 = arith.constant 0 : i32
    %c0_i32_1 = arith.constant 0 : i32
    return %c0_i32, %c0_i32_0 : i32, i32
  }
  func.func @transform_6(%arg0: i32) -> (i32, i32) {
    %c0_i32 = arith.constant 0 : i32
    %c0_i32_0 = arith.constant 0 : i32
    %c0_i32_1 = arith.constant 0 : i32
    return %c0_i32, %c0_i32_0 : i32, i32
  }
  func.func @transform_7(%arg0: i32) -> (i32, i32) {
    %c0_i32 = arith.constant 0 : i32
    %c0_i32_0 = arith.constant 0 : i32
    %c0_i32_1 = arith.constant 0 : i32
    return %c0_i32, %c0_i32_0 : i32, i32
  }
  func.func @transform_8(%arg0: i32) -> (i32, i32) {
    %c0_i32 = arith.constant 0 : i32
    %c0_i32_0 = arith.constant 0 : i32
    %c0_i32_1 = arith.constant 0 : i32
    return %c0_i32, %c0_i32_0 : i32, i32
  }
  func.func @transform_9(%arg0: i32) -> (i32, i32, i32) {
    %c0_i32 = arith.constant 0 : i32
    %c0_i32_0 = arith.constant 0 : i32
    %c0_i32_1 = arith.constant 0 : i32
    %c0_i32_2 = arith.constant 0 : i32
    return %c0_i32, %c0_i32_0, %c0_i32_1 : i32, i32, i32
  }
}

</mosaic_0001>

<bundles_post_ra>
// kernel: tpu_custom_call.1
= control target key start
LH: loop header
LB: loop body
LE: loop exit
PB: predicated region body
PF: predicated region fallthrough
CT: control target
= control target key end

     0   :  { %14 = vsyncpa [#allocation5], 0  ;;  %s3172_s0 = inlined_call_operand.hbm [shape: f32[8,8,8], index: 0, kind: input, shape index: {}]   ;;  %s3173_s1 = inlined_call_operand.hbm [shape: f32[8,32], index: 1, kind: input, shape index: {}]   ;;  %s3174_s2 = inlined_call_operand.vmem [shape: f32[32,32], index: 2, kind: input, shape index: {}]   ;;  %s3175_s3 = inlined_call_operand.vmem [shape: f32[1,32], index: 3, kind: input, shape index: {}]   ;;  %s3176_s4 = inlined_call_operand.hbm [shape: f32[32,32], index: 4, kind: input, shape index: {}]   ;;  %s3177_s5 = inlined_call_operand.hbm [shape: f32[32,32], index: 5, kind: input, shape index: {}]   ;;  %s3178_s6 = inlined_call_operand.vmem [shape: f32[1,32], index: 6, kind: input, shape index: {}]   ;;  %s3179_s7 = inlined_call_operand.vmem [shape: f32[32,4], index: 7, kind: input, shape index: {}]   ;;  %s3180_s8 = inlined_call_operand.vmem [shape: f32[1,4], index: 8, kind: input, shape index: {}]   ;;  %s3181_s9 = inlined_call_operand.vmem [shape: f32[8,8,4], index: 9, kind: output, shape index: {}]  }
   0x1   :  { %15 = vsyncpa [#allocation7], 0 }
   0x2   :  { %16 = vsyncpa [#allocation10], 0  ;;  %s2709_s30 = smov [#allocation6]   ;;  %s2710_s11 = smov [#allocation4]  }
   0x3   :  { %s35_s10 = sshll.u32 %s2709_s30, 4  ;;  %s22_s12 = sshll.u32 %s2710_s11, 4  ;;  %s36_s10 = int_to_ptr.vmem [resolvable:$true] %s35_s10  ;;  %s23_s12 = int_to_ptr.vmem [resolvable:$true] %s22_s12 }
   0x4   :  { %s2631_s13 = scalar_lea.vmem %s36_s10, 128  ;;  %p2636_p1 = scmp.lt.s32.totalorder %s36_s10, %s36_s10 }
   0x5   :  { %p2632_p0 = scmp.ne.s32.totalorder %s36_s10, %s2631_s13  ;;  %p2637_p2 = scmp.lt.s32.totalorder %s2631_s13, %s2631_s13 }
   0x7   :  { %p2638_p3 = por %p2637_p2, %p2636_p1 }
   0x9   :  { %p2639_p4 = pnand %p2638_p3, %p2632_p0 }
   0xb   :  { %2642 = shalt.err (!%p2639_p4)
}
   0xc   :  { %38 = dma.hbm_to_vmem [thread:$0]  %s3173_s1, 128, %s36_s10, [#allocation7]  }
   0xd   :  { %s2651_s16 = scalar_lea.vmem %s23_s12, 1024  ;;  %p2656_p6 = scmp.lt.s32.totalorder %s23_s12, %s23_s12 }
   0xe   :  { %p2652_p5 = scmp.ne.s32.totalorder %s23_s12, %s2651_s16  ;;  %p2657_p7 = scmp.lt.s32.totalorder %s2651_s16, %s2651_s16 }
  0x10   :  { %p2658_p8 = por %p2657_p7, %p2656_p6 }
  0x12   :  { %p2659_p9 = pnand %p2658_p8, %p2652_p5 }
  0x14   :  { %2662 = shalt.err (!%p2659_p9)
}
  0x15   :  { %s2711_s17 = smov 128   ;;  %s2712_s18 = smov 8  }
  0x16   :  { %28 = dma.hbm_to_vmem [thread:$0]  %s3172_s0, 1024, %s23_s12, [#allocation5], %s2711_s17, %s2711_s17, %s2712_s18  }
  0x17   :  { %s2713_s21 = smov [#allocation8]   ;;  %s2714_s23 = smov [#allocation9]  }
  0x18   :  { %s48_s22 = sshll.u32 %s2713_s21, 4  ;;  %s60_s24 = sshll.u32 %s2714_s23, 4  ;;  %s49_s22 = int_to_ptr.vmem [resolvable:$true] %s48_s22  ;;  %s61_s24 = int_to_ptr.vmem [resolvable:$true] %s60_s24 }
  0x19   :  { %s2671_s1 = scalar_lea.vmem %s49_s22, 512  ;;  %p2676_p11 = scmp.lt.s32.totalorder %s49_s22, %s49_s22 }
  0x1a   :  { %p2672_p10 = scmp.ne.s32.totalorder %s49_s22, %s2671_s1  ;;  %p2677_p12 = scmp.lt.s32.totalorder %s2671_s1, %s2671_s1 }
  0x1c   :  { %p2678_p13 = por %p2677_p12, %p2676_p11 }
  0x1e   :  { %p2679_p0 = pnand %p2678_p13, %p2672_p10 }
  0x20   :  { %2682 = shalt.err (!%p2679_p0)
}
  0x21   :  { %54 = dma.hbm_to_vmem [thread:$0]  %s3176_s4, 512, %s49_s22, [#allocation7], %s2711_s17, %s2711_s17, %s2712_s18  }
  0x22   :  { %s2691_s27 = scalar_lea.vmem %s61_s24, 512  ;;  %p2696_p2 = scmp.lt.s32.totalorder %s61_s24, %s61_s24 }
  0x23   :  { %p2692_p1 = scmp.ne.s32.totalorder %s61_s24, %s2691_s27  ;;  %p2697_p3 = scmp.lt.s32.totalorder %s2691_s27, %s2691_s27 }
  0x25   :  { %p2698_p4 = por %p2697_p3, %p2696_p2 }
  0x27   :  { %p2699_p5 = pnand %p2698_p4, %p2692_p1 }
  0x29   :  { %2702 = shalt.err (!%p2699_p5)
}
  0x2a   :  { %66 = dma.hbm_to_vmem [thread:$0]  %s3177_s5, 512, %s61_s24, [#allocation10], %s2711_s17, %s2711_s17, %s2712_s18  }
  0x2b   :  { %2703 = dma.done.wait [#allocation5], 1024  }
  0x2c   :  { %2704 = vsyncadd [#allocation5], 4294966272 }
  0x2d   :  { %2705 = dma.done.wait [#allocation7], 640  }
  0x2e   :  { %2706 = vsyncadd [#allocation7], 4294966656 }
  0x2f   :  { %2707 = dma.done.wait [#allocation10], 512  }
  0x30   :  { %2708 = vsyncadd [#allocation10], 4294966784  ;;  %v98_v0 = vlaneseq  ;;  %v2715_v1 = vmov 1983009808   ;;  %v2716_v5 = vmov 1934713408  }
  0x31   :  { %v96_v2 = vunpack.c.l.s4 %v2715_v1  ;;  %v160_v6 = vunpack.c.l.s4 %v2716_v5  ;;  %v229_v7 = vld [vmem:[#allocation6] sm:$0xff]  ;;  %v2537_v11 = vld [vmem:[#allocation4 + $0x8] ss:$16 sps:$4 sm:$0xff]   ;;  %v2717_v13 = vmov 0.0   ;;  %v2544_v16 = vld [vmem:[#allocation4 + $0xc] ss:$16 sps:$4 sm:$0xff]  }
  0x32   :  { %v99_v4 = vshrl.u32 %v98_v0, 7  ;;  %2293 = vmatprep.subr.mxu0 %v229_v7  ;;  %2523 = vmatprep.subr.mxu1 %v229_v7  ;;  %v2535_v10 = vld [vmem:[#allocation4] ss:$16 sps:$4 sm:$0xff]   ;;  %v2541_v14 = vld [vmem:[#allocation4 + $0x28] ss:$16 sps:$4 sm:$0xff]   ;;  %vm241_vm0 = vcmask 64512  }
  0x33   :  { %v97_v3 = vunpack.c.0.s8 %v96_v2  ;;  %v161_v9 = vunpack.c.0.s8 %v160_v6  ;;  %2294 = vmatpush3.msra.mxu0 %v229_v7  ;;  %2524 = vmatpush3.msra.mxu1 %v229_v7  ;;  %v2539_v12 = vld [vmem:[#allocation4 + $0x20] ss:$16 sps:$4 sm:$0xff]   ;;  %v2543_v15 = vld [vmem:[#allocation4 + $0x4] ss:$16 sps:$4 sm:$0xff]   ;;  %v2546_v22 = vld [vmem:[#allocation4 + $0x2c] ss:$16 sps:$4 sm:$0xff]  }
  0x34   :  { %2307 = vmatprep.subr.mxu1 %v2717_v13  ;;  %2329 = vmatprep.subr.mxu0 %v2717_v13  ;;  %v2545_v21 = vld [vmem:[#allocation4 + $0x24] ss:$16 sps:$4 sm:$0xff]   ;;  %v2821_v47 = vld [vmem:[%s3174_s2 + $0x18] sm:$0xff]  ;;  %v2838_v50 = vld [vmem:[%s3174_s2 + $0x8] sm:$0xff]  ;;  %vm2718_vm1 = vmmov 0   ;;  %vm371_vm2 = vcmask 261120  }
  0x35   :  { %v2781_v8 = vsub.s32 %v97_v3, %v99_v4  ;;  %v2794_v20 = vsub.s32 %v161_v9, %v99_v4  ;;  %v2829_v48 = vld [vmem:[%s3174_s2 + $0x10] sm:$0xff]  ;;  %v2848_v51 = vld [vmem:[%s3174_s2] sm:$0xff]  ;;  %vm2115_vm3 = vcmask 31744  }
  0x36   :  { %v2875_v52 = vld [vmem:[%s3175_s3] ss:$0 sm:$0xff] }
  0x37   :  { %v2786_v17 = vrot.slane %v2535_v10, %v2781_v8  ;;  %v2789_v18 = vrot.slane %v2537_v11, %v2781_v8  ;;  %v2792_v19 = vrot.slane %v2539_v12, %v2781_v8  ;;  %v2797_v23 = vrot.slane %v2541_v14, %v2781_v8 }
  0x38   :  { %v108_v24 = vrot.slane %v2543_v15, %v2781_v8  ;;  %v124_v25 = vrot.slane %v2544_v16, %v2781_v8  ;;  %v140_v28 = vrot.slane %v2545_v21, %v2781_v8  ;;  %v156_v29 = vrot.slane %v2546_v22, %v2781_v8 }
  0x39   :  { %v157_v26 = vcombine.low %v2786_v17, %v2789_v18  ;;  %v158_v27 = vcombine.high %v2786_v17, %v2789_v18  ;;  %v189_v30 = vcombine.low %v2792_v19, %v2797_v23  ;;  %v190_v31 = vcombine.high %v2792_v19, %v2797_v23 }
  0x3a   :  { %v173_v32 = vcombine.low %v108_v24, %v124_v25  ;;  %v174_v33 = vcombine.high %v108_v24, %v124_v25  ;;  %v205_v35 = vcombine.low %v140_v28, %v156_v29  ;;  %v206_v36 = vcombine.high %v140_v28, %v156_v29 }
  0x3b   :  { %v165_v34 = vrot.slane %v157_v26, %v2794_v20  ;;  %v197_v37 = vrot.slane %v189_v30, %v2794_v20  ;;  %v172_v6 = vrot.slane %v158_v27, %v2794_v20  ;;  %v204_v7 = vrot.slane %v190_v31, %v2794_v20 }
  0x3c   :  { %v181_v38 = vrot.slane %v173_v32, %v2794_v20  ;;  %v188_v39 = vrot.slane %v174_v33, %v2794_v20  ;;  %v213_v40 = vrot.slane %v205_v35, %v2794_v20  ;;  %v220_v41 = vrot.slane %v206_v36, %v2794_v20 }
  0x3d   :  { %v221_v42 = vcombine.low %v165_v34, %v197_v37  ;;  %v222_v43 = vcombine.high %v165_v34, %v197_v37  ;;  %v223_v9 = vcombine.low %v172_v6, %v204_v7  ;;  %v224_v10 = vcombine.high %v172_v6, %v204_v7  ;;  %v1021_v37 = vld [vmem:[#allocation8 + $0x18] sm:$0xff] }
  0x3e   :  { %v225_v44 = vcombine.low %v181_v38, %v213_v40  ;;  %v226_v45 = vcombine.high %v181_v38, %v213_v40  ;;  %v227_v46 = vcombine.low %v188_v39, %v220_v41  ;;  %v228_v49 = vcombine.high %v188_v39, %v220_v41 }
  0x3f   :  { %2295 = vmatprep.mubr.msk.f32.mxu0 %vm241_vm0, %v221_v42 }
  0x40   :  { %2296 = vmatmul.mubr.msk.f32.vlgmr.msra.gmra.mxu0 %vm241_vm0, %v222_v43  ;;  %2301 = vmatprep.mubr.msk.f32.mxu1 %vm241_vm0, %v225_v44  ;;  %v1020_v43 = vld [vmem:[#allocation8 + $0x10] sm:$0xff] }
  0x41   :  { %2302 = vmatmul.mubr.msk.f32.vlgmr.msra.gmra.mxu1 %vm241_vm0, %v226_v45  ;;  %2330 = vmatpush3.msra.mxu0 %v2821_v47  ;;  %v1019_v45 = vld [vmem:[#allocation8 + $0x8] sm:$0xff] }
  0x42   :  { %2308 = vmatpush3.msra.mxu1 %v2821_v47  ;;  %2304 = vmatprep.mubr.msk.f32.mxu1 %vm241_vm0, %v227_v46  ;;  %v1018_v46 = vld [vmem:[#allocation8] sm:$0xff] }
  0x43   :  { %2309 = vmatprep.subr.mxu1 %v2717_v13  ;;  %2331 = vmatprep.subr.mxu0 %v2717_v13 }
  0x44   :  { %2310 = vmatpush3.msra.mxu1 %v2829_v48  ;;  %2332 = vmatpush3.msra.mxu0 %v2829_v48 }
  0x45   :  { %2305 = vmatmul.mubr.msk.f32.gmra.mxu1 %vm241_vm0, %v228_v49  ;;  %2311 = vmatprep.subr.mxu1 %v2717_v13 }
  0x46   :  { %2312 = vmatpush3.msra.mxu1 %v2838_v50  ;;  %2315 = vmatprep.mubr.msk.f32.mxu1 %vm2718_vm1, %v2717_v13 }
  0x47   :  { %2313 = vmatprep.subr.mxu1 %v2717_v13  ;;  %2333 = vmatprep.subr.mxu0 %v2717_v13 }
  0x48   :  { %2314 = vmatpush3.msra.mxu1 %v2848_v51  ;;  %2334 = vmatpush3.msra.mxu0 %v2838_v50 }
  0x49   :  { %2316 = vmatmul.mubr.f32.vlgmr.msra.gmra.mxu1 %v2717_v13  ;;  %2318 = vmatprep.subr.mxu1 %v2717_v13 }
  0x4a   :  { %2319 = vmatpush3.msra.mxu1 %v2821_v47  ;;  %2326 = vmatprep.mubr.msk.f32.mxu1 %vm2718_vm1, %v2717_v13 }
  0x4b   :  { %2320 = vmatprep.subr.mxu1 %v2717_v13  ;;  %2335 = vmatprep.subr.mxu0 %v2717_v13 }
  0x4c   :  { %2321 = vmatpush3.msra.mxu1 %v2829_v48  ;;  %2336 = vmatpush3.msra.mxu0 %v2848_v51 }
  0x4d   :  { %2322 = vmatprep.subr.mxu1 %v2717_v13  ;;  %2351 = vmatprep.subr.mxu0 %v2717_v13 }
  0x4e   :  { %2323 = vmatpush3.msra.mxu1 %v2838_v50  ;;  %2298 = vmatprep.mubr.msk.f32.mxu0 %vm241_vm0, %v223_v9 }
  0x4f   :  { %2324 = vmatprep.subr.mxu1 %v2717_v13  ;;  %2299 = vmatmul.mubr.msk.f32.gmra.mxu0 %vm241_vm0, %v224_v10 }
  0x50   :  { %2325 = vmatpush3.msra.mxu1 %v2848_v51  ;;  %2337 = vmatprep.mubr.msk.f32.mxu0 %vm2718_vm1, %v2717_v13 }
  0x51   :  { %2340 = vmatprep.subr.mxu1 %v2717_v13 }
 0x100   :  { %v2297_v53 = vpop.f32.mrf.mxu0 }
 0x101   :  { %v338_v54 = vadd.f32 %v2297_v53, %v2875_v52  ;;  %v2303_v55 = vpop.f32.mrf.mxu1  ;;  %v2976_v53 = vld [vmem:[#allocation9 + $0x10] sm:$0xff] }
 0x102   :  { %v332_v56 = vpop.f32.mrf.mxu0  ;;  %v358_v57 = vadd.f32 %v2303_v55, %v2875_v52  ;;  %v2984_v55 = vld [vmem:[#allocation9] sm:$0xff] }
 0x103   :  { %373 = vst.msk [vmem:[#allocation2 + $0x8] sm:$0xff] %vm371_vm2, %v338_v54  ;;  %v333_v58 = vadd.f32 %v2875_v52, %v332_v56  ;;  %v352_v59 = vpop.f32.mrf.mxu1  ;;  %v2980_v54 = vld [vmem:[#allocation9 + $0x8] sm:$0xff] }
 0x104   :  { %377 = vst.msk [vmem:[#allocation2 + $0x28] sm:$0xff] %vm371_vm2, %v358_v57  ;;  %v353_v60 = vadd.f32 %v2875_v52, %v352_v59 }
 0x105   :  { %372 = vst.msk [vmem:[#allocation2] sm:$0xff] %vm371_vm2, %v333_v58  ;;  %v2306_v61 = vpop.f32.mrf.mxu1 }
 0x106   :  { %376 = vst.msk [vmem:[#allocation2 + $0x20] sm:$0xff] %vm371_vm2, %v353_v60  ;;  %v368_v62 = vadd.f32 %v2306_v61, %v2875_v52  ;;  %v2992_v60 = vld [vmem:[%s3178_s6] ss:$0 sm:$0xff] }
 0x107   :  { %v362_v63 = vpop.f32.mrf.mxu1 }
 0x108   :  { %379 = vst.msk [vmem:[#allocation2 + $0x38] sm:$0xff] %vm371_vm2, %v368_v62  ;;  %v363_v0 = vadd.f32 %v2875_v52, %v362_v63 }
 0x109   :  { %v450_v1 = vpop.f32.mrf.mxu1 }
 0x10a   :  { %378 = vst.msk [vmem:[#allocation2 + $0x30] sm:$0xff] %vm371_vm2, %v363_v0  ;;  %v458_v11 = vld [vmem:[#allocation2 + $0x8] sm:$0xff] }
 0x10b   :  { %v2317_v2 = vpop.f32.mrf.mxu1  ;;  %v774_v38 = vld [vmem:[#allocation2 + $0x28] sm:$0xff] }
 0x10c   :  { %v380_v3 = vld [vmem:[#allocation2] sm:$0xff] }
 0x10d   :  { %v454_v4 = vadd.f32 %v450_v1, %v380_v3  ;;  %v695_v32 = vld [vmem:[#allocation2 + $0x20] sm:$0xff] }
 0x10f   :  { %2559 = vtanh.f32 %v454_v4  ;;  %v2300_v17 = vpop.f32.mrf.mxu0 }
 0x110   :  { %v348_v18 = vadd.f32 %v2300_v17, %v2875_v52 }
 0x111   :  { %v342_v19 = vpop.f32.mrf.mxu0  ;;  %v853_v56 = vld [vmem:[#allocation2 + $0x30] sm:$0xff] }
 0x112   :  { %375 = vst.msk [vmem:[#allocation2 + $0x18] sm:$0xff] %vm371_vm2, %v348_v18  ;;  %v343_v21 = vadd.f32 %v2875_v52, %v342_v19  ;;  %v2973_v52 = vld [vmem:[#allocation9 + $0x18] sm:$0xff] }
 0x114   :  { %374 = vst.msk [vmem:[#allocation2 + $0x10] sm:$0xff] %vm371_vm2, %v343_v21 }
 0x119   :  { %v616_v27 = vld [vmem:[#allocation2 + $0x18] sm:$0xff] }
 0x11b   :  { %v537_v22 = vld [vmem:[#allocation2 + $0x10] sm:$0xff] }
 0x11c   :  { %v2560_v5 = vpop.eup %2559 }
 0x11d   :  { %456 = vst.msk [vmem:[#allocation3] sm:$0xff] %vm371_vm2, %v2560_v5  ;;  %2327 = vmatmul.mubr.msk.f32.vlgmr.msra.gmra.mxu1 %vm371_vm2, %v2560_v5 }
 0x11e   :  { %2341 = vmatpush3.msra.mxu1 %v2821_v47  ;;  %2348 = vmatprep.mubr.msk.f32.mxu1 %vm2718_vm1, %v2717_v13 }
 0x11f   :  { %2342 = vmatprep.subr.mxu1 %v2717_v13 }
 0x120   :  { %2343 = vmatpush3.msra.mxu1 %v2829_v48 }
 0x121   :  { %2344 = vmatprep.subr.mxu1 %v2717_v13 }
 0x122   :  { %2345 = vmatpush3.msra.mxu1 %v2838_v50 }
 0x123   :  { %2346 = vmatprep.subr.mxu1 %v2717_v13 }
 0x124   :  { %2347 = vmatpush3.msra.mxu1 %v2848_v51  ;;  %v1010_v44 = vld [vmem:[#allocation3] sm:$0xff] }
 0x125   :  { %2362 = vmatprep.subr.mxu1 %v2717_v13 }
 0x1dd   :  { %v528_v12 = vpop.f32.mrf.mxu1 }
 0x1de   :  { %v532_v14 = vadd.f32 %v528_v12, %v458_v11  ;;  %v932_v12 = vld [vmem:[#allocation2 + $0x38] sm:$0xff] }
 0x1df   :  { %v2328_v15 = vpop.f32.mrf.mxu1 }
 0x1e0   :  { %2561 = vtanh.f32 %v532_v14 }
 0x1ed   :  { %v2562_v16 = vpop.eup %2561 }
 0x1ee   :  { %535 = vst.msk [vmem:[#allocation3 + $0x8] sm:$0xff] %vm371_vm2, %v2562_v16  ;;  %2338 = vmatmul.mubr.msk.f32.vlgmr.msra.gmra.mxu0 %vm371_vm2, %v2562_v16 }
 0x1ef   :  { %2352 = vmatpush3.msra.mxu0 %v2821_v47  ;;  %2359 = vmatprep.mubr.msk.f32.mxu0 %vm2718_vm1, %v2717_v13 }
 0x1f0   :  { %2353 = vmatprep.subr.mxu0 %v2717_v13 }
 0x1f1   :  { %2354 = vmatpush3.msra.mxu0 %v2829_v48 }
 0x1f2   :  { %2355 = vmatprep.subr.mxu0 %v2717_v13 }
 0x1f3   :  { %2356 = vmatpush3.msra.mxu0 %v2838_v50 }
 0x1f4   :  { %2357 = vmatprep.subr.mxu0 %v2717_v13 }
 0x1f5   :  { %2358 = vmatpush3.msra.mxu0 %v2848_v51 }
 0x1f6   :  { %2373 = vmatprep.subr.mxu0 %v2717_v13 }
 0x2ae   :  { %v607_v23 = vpop.f32.mrf.mxu0 }
 0x2af   :  { %v611_v24 = vadd.f32 %v607_v23, %v537_v22 }
 0x2b0   :  { %v2339_v25 = vpop.f32.mrf.mxu0 }
 0x2b1   :  { %2563 = vtanh.f32 %v611_v24 }
 0x2be   :  { %v2564_v26 = vpop.eup %2563 }
 0x2bf   :  { %614 = vst.msk [vmem:[#allocation3 + $0x10] sm:$0xff] %vm371_vm2, %v2564_v26  ;;  %2349 = vmatmul.mubr.msk.f32.vlgmr.msra.gmra.mxu1 %vm371_vm2, %v2564_v26 }
 0x2c0   :  { %2363 = vmatpush3.msra.mxu1 %v2821_v47  ;;  %2370 = vmatprep.mubr.msk.f32.mxu1 %vm2718_vm1, %v2717_v13 }
 0x2c1   :  { %2364 = vmatprep.subr.mxu1 %v2717_v13 }
 0x2c2   :  { %2365 = vmatpush3.msra.mxu1 %v2829_v48 }
 0x2c3   :  { %2366 = vmatprep.subr.mxu1 %v2717_v13 }
 0x2c4   :  { %2367 = vmatpush3.msra.mxu1 %v2838_v50 }
 0x2c5   :  { %2368 = vmatprep.subr.mxu1 %v2717_v13 }
 0x2c6   :  { %2369 = vmatpush3.msra.mxu1 %v2848_v51 }
 0x2c7   :  { %2384 = vmatprep.subr.mxu1 %v2717_v13 }
 0x37f   :  { %v686_v28 = vpop.f32.mrf.mxu1 }
 0x380   :  { %v690_v29 = vadd.f32 %v686_v28, %v616_v27 }
 0x381   :  { %v2350_v30 = vpop.f32.mrf.mxu1 }
 0x382   :  { %2565 = vtanh.f32 %v690_v29 }
 0x38f   :  { %v2566_v31 = vpop.eup %2565 }
 0x390   :  { %693 = vst.msk [vmem:[#allocation3 + $0x18] sm:$0xff] %vm371_vm2, %v2566_v31  ;;  %2360 = vmatmul.mubr.msk.f32.vlgmr.msra.gmra.mxu0 %vm371_vm2, %v2566_v31 }
 0x391   :  { %2374 = vmatpush3.msra.mxu0 %v2821_v47  ;;  %2381 = vmatprep.mubr.msk.f32.mxu0 %vm2718_vm1, %v2717_v13 }
 0x392   :  { %2375 = vmatprep.subr.mxu0 %v2717_v13 }
 0x393   :  { %2376 = vmatpush3.msra.mxu0 %v2829_v48 }
 0x394   :  { %2377 = vmatprep.subr.mxu0 %v2717_v13 }
 0x395   :  { %2378 = vmatpush3.msra.mxu0 %v2838_v50 }
 0x396   :  { %2379 = vmatprep.subr.mxu0 %v2717_v13 }
 0x397   :  { %2380 = vmatpush3.msra.mxu0 %v2848_v51  ;;  %v1013_v49 = vld [vmem:[#allocation3 + $0x18] sm:$0xff] }
 0x398   :  { %2395 = vmatprep.subr.mxu0 %v1021_v37 }
 0x450   :  { %v765_v33 = vpop.f32.mrf.mxu0 }
 0x451   :  { %v769_v34 = vadd.f32 %v765_v33, %v695_v32 }
 0x452   :  { %v2361_v35 = vpop.f32.mrf.mxu0 }
 0x453   :  { %2567 = vtanh.f32 %v769_v34 }
 0x460   :  { %v2568_v36 = vpop.eup %2567 }
 0x461   :  { %772 = vst.msk [vmem:[#allocation3 + $0x20] sm:$0xff] %vm371_vm2, %v2568_v36  ;;  %2371 = vmatmul.mubr.msk.f32.vlgmr.msra.gmra.mxu1 %vm371_vm2, %v2568_v36 }
 0x462   :  { %2385 = vmatpush3.msra.mxu1 %v2821_v47  ;;  %2392 = vmatprep.mubr.msk.f32.mxu1 %vm2718_vm1, %v2717_v13  ;;  %v1011_v47 = vld [vmem:[#allocation3 + $0x8] sm:$0xff] }
 0x463   :  { %2386 = vmatprep.subr.mxu1 %v2717_v13 }
 0x464   :  { %2387 = vmatpush3.msra.mxu1 %v2829_v48  ;;  %v1012_v48 = vld [vmem:[#allocation3 + $0x10] sm:$0xff] }
 0x465   :  { %2388 = vmatprep.subr.mxu1 %v2717_v13 }
 0x466   :  { %2389 = vmatpush3.msra.mxu1 %v2838_v50 }
 0x467   :  { %2390 = vmatprep.subr.mxu1 %v2717_v13 }
 0x468   :  { %2391 = vmatpush3.msra.mxu1 %v2848_v51  ;;  %v1014_v50 = vld [vmem:[#allocation3 + $0x20] sm:$0xff] }
 0x469   :  { %2415 = vmatprep.subr.mxu1 %v2717_v13 }
 0x521   :  { %v844_v39 = vpop.f32.mrf.mxu1 }
 0x522   :  { %v848_v40 = vadd.f32 %v844_v39, %v774_v38 }
 0x523   :  { %v2372_v41 = vpop.f32.mrf.mxu1 }
 0x524   :  { %2569 = vtanh.f32 %v848_v40 }
 0x531   :  { %v2570_v42 = vpop.eup %2569 }
 0x532   :  { %851 = vst.msk [vmem:[#allocation3 + $0x28] sm:$0xff] %vm371_vm2, %v2570_v42  ;;  %2382 = vmatmul.mubr.msk.f32.vlgmr.msra.gmra.mxu0 %vm371_vm2, %v2570_v42 }
 0x533   :  { %2396 = vmatpush3.msra.mxu0 %v1021_v37  ;;  %2403 = vmatprep.mubr.msk.f32.mxu0 %vm371_vm2, %v1010_v44 }
 0x534   :  { %2397 = vmatprep.subr.mxu0 %v1020_v43 }
 0x535   :  { %2398 = vmatpush3.msra.mxu0 %v1020_v43 }
 0x536   :  { %2399 = vmatprep.subr.mxu0 %v1019_v45 }
 0x537   :  { %2400 = vmatpush3.msra.mxu0 %v1019_v45 }
 0x538   :  { %2401 = vmatprep.subr.mxu0 %v1018_v46 }
 0x539   :  { %2402 = vmatpush3.msra.mxu0 %v1018_v46  ;;  %v1015_v51 = vld [vmem:[#allocation3 + $0x28] sm:$0xff] }
 0x53a   :  { %2404 = vmatmul.mubr.msk.f32.vlgmr.msra.gmra.mxu0 %vm371_vm2, %v1011_v47  ;;  %2437 = vmatprep.subr.mxu0 %v2717_v13 }
 0x53b   :  { %2406 = vmatprep.mubr.msk.f32.mxu0 %vm371_vm2, %v1012_v48  ;;  %2438 = vmatpush3.msra.mxu0 %v2973_v52 }
 0x53c   :  { %2439 = vmatprep.subr.mxu0 %v2717_v13 }
 0x53d   :  { %2440 = vmatpush3.msra.mxu0 %v2976_v53 }
 0x53e   :  { %2407 = vmatmul.mubr.msk.f32.gmra.mxu0 %vm371_vm2, %v1013_v49  ;;  %2441 = vmatprep.subr.mxu0 %v2717_v13 }
 0x53f   :  { %2409 = vmatprep.mubr.msk.f32.mxu0 %vm371_vm2, %v1014_v50  ;;  %2442 = vmatpush3.msra.mxu0 %v2980_v54 }
 0x540   :  { %2443 = vmatprep.subr.mxu0 %v2717_v13 }
 0x541   :  { %2444 = vmatpush3.msra.mxu0 %v2984_v55 }
 0x542   :  { %2410 = vmatmul.mubr.msk.f32.gmra.mxu0 %vm371_vm2, %v1015_v51  ;;  %2459 = vmatprep.subr.mxu0 %v2717_v13 }
 0x5f2   :  { %v923_v57 = vpop.f32.mrf.mxu0 }
 0x5f3   :  { %v927_v58 = vadd.f32 %v923_v57, %v853_v56 }
 0x5f4   :  { %v2383_v59 = vpop.f32.mrf.mxu0 }
 0x5f5   :  { %2571 = vtanh.f32 %v927_v58 }
 0x5fa   :  { %v2405_v61 = vpop.f32.mrf.mxu0 }
 0x5fb   :  { %v1129_v62 = vadd.f32 %v2405_v61, %v2992_v60  ;;  %v1927_v61 = vld [vmem:[%s3179_s7] sm:$0xff] }
 0x5fc   :  { %v1123_v63 = vpop.f32.mrf.mxu0 }
 0x5fd   :  { %1163 = vst.msk [vmem:[#allocation2 + $0x8] sm:$0xff] %vm371_vm2, %v1129_v62  ;;  %v1124_v0 = vadd.f32 %v2992_v60, %v1123_v63 }
 0x5fe   :  { %v2408_v1 = vpop.f32.mrf.mxu0 }
 0x5ff   :  { %1162 = vst.msk [vmem:[#allocation2] sm:$0xff] %vm371_vm2, %v1124_v0  ;;  %v1139_v2 = vadd.f32 %v2408_v1, %v2992_v60 }
 0x600   :  { %v1133_v3 = vpop.f32.mrf.mxu0 }
 0x601   :  { %1165 = vst.msk [vmem:[#allocation2 + $0x18] sm:$0xff] %vm371_vm2, %v1139_v2  ;;  %v1134_v4 = vadd.f32 %v2992_v60, %v1133_v3 }
 0x602   :  { %v2572_v5 = vpop.eup %2571  ;;  %v2411_v6 = vpop.f32.mrf.mxu0 }
 0x603   :  { %930 = vst.msk [vmem:[#allocation3 + $0x30] sm:$0xff] %vm371_vm2, %v2572_v5  ;;  %1164 = vst.msk [vmem:[#allocation2 + $0x10] sm:$0xff] %vm371_vm2, %v1134_v4  ;;  %v1149_v7 = vadd.f32 %v2411_v6, %v2992_v60  ;;  %2393 = vmatmul.mubr.msk.f32.vlgmr.msra.gmra.mxu1 %vm371_vm2, %v2572_v5 }
 0x604   :  { %v1143_v9 = vpop.f32.mrf.mxu0  ;;  %2416 = vmatpush3.msra.mxu1 %v2973_v52  ;;  %2423 = vmatprep.mubr.msk.f32.mxu1 %vm2718_vm1, %v2717_v13  ;;  %v1244_v25 = vld [vmem:[#allocation2 + $0x8] sm:$0xff] }
 0x605   :  { %1167 = vst.msk [vmem:[#allocation2 + $0x28] sm:$0xff] %vm371_vm2, %v1149_v7  ;;  %v1144_v10 = vadd.f32 %v2992_v60, %v1143_v9  ;;  %2417 = vmatprep.subr.mxu1 %v2717_v13 }
 0x606   :  { %2418 = vmatpush3.msra.mxu1 %v2976_v53  ;;  %v1170_v17 = vld [vmem:[#allocation2] sm:$0xff] }
 0x607   :  { %1166 = vst.msk [vmem:[#allocation2 + $0x20] sm:$0xff] %vm371_vm2, %v1144_v10  ;;  %2419 = vmatprep.subr.mxu1 %v2717_v13 }
 0x608   :  { %2420 = vmatpush3.msra.mxu1 %v2980_v54  ;;  %v1398_v39 = vld [vmem:[#allocation2 + $0x18] sm:$0xff] }
 0x609   :  { %2421 = vmatprep.subr.mxu1 %v2717_v13 }
 0x60a   :  { %2422 = vmatpush3.msra.mxu1 %v2984_v55  ;;  %v1016_v11 = vld [vmem:[#allocation3 + $0x30] sm:$0xff] }
 0x60b   :  { %2424 = vmatmul.mubr.f32.vlgmr.msra.gmra.mxu1 %v2717_v13  ;;  %2412 = vmatprep.mubr.msk.f32.mxu0 %vm371_vm2, %v1016_v11  ;;  %v1321_v34 = vld [vmem:[#allocation2 + $0x10] sm:$0xff] }
 0x60c   :  { %2426 = vmatprep.subr.mxu1 %v2717_v13  ;;  %2434 = vmatprep.mubr.msk.f32.mxu1 %vm2718_vm1, %v2717_v13  ;;  %v1552_v49 = vld [vmem:[#allocation2 + $0x28] sm:$0xff] }
 0x60d   :  { %2427 = vmatpush3.msra.mxu1 %v2973_v52 }
 0x60e   :  { %2428 = vmatprep.subr.mxu1 %v2717_v13  ;;  %v1475_v44 = vld [vmem:[#allocation2 + $0x20] sm:$0xff] }
 0x60f   :  { %2429 = vmatpush3.msra.mxu1 %v2976_v53 }
 0x610   :  { %2430 = vmatprep.subr.mxu1 %v2717_v13 }
 0x611   :  { %2431 = vmatpush3.msra.mxu1 %v2980_v54 }
 0x612   :  { %2432 = vmatprep.subr.mxu1 %v2717_v13 }
 0x613   :  { %2433 = vmatpush3.msra.mxu1 %v2984_v55 }
 0x614   :  { %2448 = vmatprep.subr.mxu1 %v2717_v13 }
 0x6c3   :  { %v1002_v14 = vpop.f32.mrf.mxu1 }
 0x6c4   :  { %v1006_v15 = vadd.f32 %v1002_v14, %v932_v12 }
 0x6c5   :  { %v2394_v16 = vpop.f32.mrf.mxu1 }
 0x6c6   :  { %2573 = vtanh.f32 %v1006_v15 }
 0x6cb   :  { %v1237_v18 = vpop.f32.mrf.mxu1 }
 0x6cc   :  { %v1241_v19 = vadd.f32 %v1237_v18, %v1170_v17 }
 0x6cd   :  { %v2425_v21 = vpop.f32.mrf.mxu1 }
 0x6ce   :  { %2575 = vtanh.f32 %v1241_v19 }
 0x6d3   :  { %v2574_v22 = vpop.eup %2573 }
 0x6d4   :  { %1009 = vst.msk [vmem:[#allocation3 + $0x38] sm:$0xff] %vm371_vm2, %v2574_v22 }
 0x6db   :  { %v2576_v23 = vpop.eup %2575  ;;  %v1017_v24 = vld [vmem:[#allocation3 + $0x38] sm:$0xff] }
 0x6dc   :  { %1243 = vst.msk [vmem:[#allocation3] sm:$0xff] %vm371_vm2, %v2576_v23  ;;  %2435 = vmatmul.mubr.msk.f32.vlgmr.msra.gmra.mxu1 %vm371_vm2, %v2576_v23  ;;  %2413 = vmatmul.mubr.msk.f32.gmra.mxu0 %vm371_vm2, %v1017_v24 }
 0x6dd   :  { %2445 = vmatprep.mubr.msk.f32.mxu0 %vm2718_vm1, %v2717_v13  ;;  %2449 = vmatpush3.msra.mxu1 %v2973_v52 }
 0x6de   :  { %2450 = vmatprep.subr.mxu1 %v2717_v13  ;;  %2456 = vmatprep.mubr.msk.f32.mxu1 %vm2718_vm1, %v2717_v13 }
 0x6df   :  { %2451 = vmatpush3.msra.mxu1 %v2976_v53 }
 0x6e0   :  { %2452 = vmatprep.subr.mxu1 %v2717_v13 }
 0x6e1   :  { %2453 = vmatpush3.msra.mxu1 %v2980_v54 }
 0x6e2   :  { %2454 = vmatprep.subr.mxu1 %v2717_v13 }
 0x6e3   :  { %2455 = vmatpush3.msra.mxu1 %v2984_v55 }
 0x6e4   :  { %2470 = vmatprep.subr.mxu1 %v2717_v13 }
 0x79c   :  { %v1314_v26 = vpop.f32.mrf.mxu1  ;;  %v2414_v27 = vpop.f32.mrf.mxu0 }
 0x79d   :  { %v1318_v28 = vadd.f32 %v1314_v26, %v1244_v25  ;;  %v1159_v29 = vadd.f32 %v2414_v27, %v2992_v60 }
 0x79e   :  { %v2436_v30 = vpop.f32.mrf.mxu1  ;;  %v1153_v31 = vpop.f32.mrf.mxu0 }
 0x79f   :  { %2577 = vtanh.f32 %v1318_v28  ;;  %1169 = vst.msk [vmem:[#allocation2 + $0x38] sm:$0xff] %vm371_vm2, %v1159_v29  ;;  %v1154_v32 = vadd.f32 %v2992_v60, %v1153_v31  ;;  %v1928_v60 = vld [vmem:[%s3179_s7 + $0x8] sm:$0xff] }
 0x7a1   :  { %1168 = vst.msk [vmem:[#allocation2 + $0x30] sm:$0xff] %vm371_vm2, %v1154_v32 }
 0x7a6   :  { %v1706_v62 = vld [vmem:[#allocation2 + $0x38] sm:$0xff] }
 0x7a8   :  { %v1629_v57 = vld [vmem:[#allocation2 + $0x30] sm:$0xff] }
 0x7ac   :  { %v2578_v33 = vpop.eup %2577 }
 0x7ad   :  { %1320 = vst.msk [vmem:[#allocation3 + $0x8] sm:$0xff] %vm371_vm2, %v2578_v33  ;;  %2446 = vmatmul.mubr.msk.f32.vlgmr.msra.gmra.mxu0 %vm371_vm2, %v2578_v33 }
 0x7ae   :  { %2460 = vmatpush3.msra.mxu0 %v2973_v52  ;;  %2467 = vmatprep.mubr.msk.f32.mxu0 %vm2718_vm1, %v2717_v13 }
 0x7af   :  { %2461 = vmatprep.subr.mxu0 %v2717_v13 }
 0x7b0   :  { %2462 = vmatpush3.msra.mxu0 %v2976_v53 }
 0x7b1   :  { %2463 = vmatprep.subr.mxu0 %v2717_v13 }
 0x7b2   :  { %2464 = vmatpush3.msra.mxu0 %v2980_v54 }
 0x7b3   :  { %2465 = vmatprep.subr.mxu0 %v2717_v13 }
 0x7b4   :  { %2466 = vmatpush3.msra.mxu0 %v2984_v55 }
 0x7b5   :  { %2481 = vmatprep.subr.mxu0 %v2717_v13 }
 0x86d   :  { %v1391_v35 = vpop.f32.mrf.mxu0 }
 0x86e   :  { %v1395_v36 = vadd.f32 %v1391_v35, %v1321_v34 }
 0x86f   :  { %v2447_v37 = vpop.f32.mrf.mxu0 }
 0x870   :  { %2579 = vtanh.f32 %v1395_v36 }
 0x87d   :  { %v2580_v38 = vpop.eup %2579 }
 0x87e   :  { %1397 = vst.msk [vmem:[#allocation3 + $0x10] sm:$0xff] %vm371_vm2, %v2580_v38  ;;  %2457 = vmatmul.mubr.msk.f32.vlgmr.msra.gmra.mxu1 %vm371_vm2, %v2580_v38 }
 0x87f   :  { %2471 = vmatpush3.msra.mxu1 %v2973_v52  ;;  %2478 = vmatprep.mubr.msk.f32.mxu1 %vm2718_vm1, %v2717_v13 }
 0x880   :  { %2472 = vmatprep.subr.mxu1 %v2717_v13 }
 0x881   :  { %2473 = vmatpush3.msra.mxu1 %v2976_v53 }
 0x882   :  { %2474 = vmatprep.subr.mxu1 %v2717_v13 }
 0x883   :  { %2475 = vmatpush3.msra.mxu1 %v2980_v54 }
 0x884   :  { %2476 = vmatprep.subr.mxu1 %v2717_v13 }
 0x885   :  { %2477 = vmatpush3.msra.mxu1 %v2984_v55  ;;  %v2547_v4 = vld [vmem:[#allocation3] ss:$16 sps:$4 sm:$0xff]   ;;  %v2555_v14 = vld [vmem:[#allocation3 + $0x4] ss:$16 sps:$4 sm:$0xff]  }
 0x886   :  { %2492 = vmatprep.subr.mxu1 %v2717_v13  ;;  %v1799_v10 = vrot.slane %v2547_v4, %v2781_v8  ;;  %v1806_v25 = vrot.slane %v2555_v14, %v2781_v8 }
 0x93e   :  { %v1468_v40 = vpop.f32.mrf.mxu1 }
 0x93f   :  { %v1472_v41 = vadd.f32 %v1468_v40, %v1398_v39 }
 0x940   :  { %v2458_v42 = vpop.f32.mrf.mxu1 }
 0x941   :  { %2581 = vtanh.f32 %v1472_v41 }
 0x94e   :  { %v2582_v43 = vpop.eup %2581 }
 0x94f   :  { %1474 = vst.msk [vmem:[#allocation3 + $0x18] sm:$0xff] %vm371_vm2, %v2582_v43  ;;  %2468 = vmatmul.mubr.msk.f32.vlgmr.msra.gmra.mxu0 %vm371_vm2, %v2582_v43 }
 0x950   :  { %2482 = vmatpush3.msra.mxu0 %v2973_v52  ;;  %2489 = vmatprep.mubr.msk.f32.mxu0 %vm2718_vm1, %v2717_v13 }
 0x951   :  { %2483 = vmatprep.subr.mxu0 %v2717_v13 }
 0x952   :  { %2484 = vmatpush3.msra.mxu0 %v2976_v53 }
 0x953   :  { %2485 = vmatprep.subr.mxu0 %v2717_v13 }
 0x954   :  { %2486 = vmatpush3.msra.mxu0 %v2980_v54 }
 0x955   :  { %2487 = vmatprep.subr.mxu0 %v2717_v13 }
 0x956   :  { %2488 = vmatpush3.msra.mxu0 %v2984_v55  ;;  %v2549_v3 = vld [vmem:[#allocation3 + $0x8] ss:$16 sps:$4 sm:$0xff]   ;;  %v2556_v7 = vld [vmem:[#allocation3 + $0xc] ss:$16 sps:$4 sm:$0xff]  }
 0x957   :  { %v1815_v5 = vrot.slane %v2549_v3, %v2781_v8  ;;  %v1822_v19 = vrot.slane %v2556_v7, %v2781_v8 }
 0x959   :  { %v1855_v17 = vcombine.low %v1799_v10, %v1815_v5  ;;  %v1856_v22 = vcombine.high %v1799_v10, %v1815_v5  ;;  %v1871_v33 = vcombine.low %v1806_v25, %v1822_v19  ;;  %v1872_v37 = vcombine.high %v1806_v25, %v1822_v19 }
 0x95b   :  { %v1863_v26 = vrot.slane %v1855_v17, %v2794_v20  ;;  %v1870_v32 = vrot.slane %v1856_v22, %v2794_v20  ;;  %v1886_v41 = vrot.slane %v1872_v37, %v2794_v20 }
 0xa0f   :  { %v1545_v45 = vpop.f32.mrf.mxu0 }
 0xa10   :  { %v1549_v46 = vadd.f32 %v1545_v45, %v1475_v44  ;;  %v2163_v45 = vld [vmem:[%s3180_s8] ss:$0 sm:$0xff] }
 0xa11   :  { %v2469_v47 = vpop.f32.mrf.mxu0 }
 0xa12   :  { %2583 = vtanh.f32 %v1549_v46 }
 0xa1f   :  { %v2584_v48 = vpop.eup %2583 }
 0xa20   :  { %1551 = vst.msk [vmem:[#allocation3 + $0x20] sm:$0xff] %vm371_vm2, %v2584_v48  ;;  %2479 = vmatmul.mubr.msk.f32.vlgmr.msra.gmra.mxu1 %vm371_vm2, %v2584_v48 }
 0xa21   :  { %2493 = vmatpush3.msra.mxu1 %v2973_v52  ;;  %2500 = vmatprep.mubr.msk.f32.mxu1 %vm2718_vm1, %v2717_v13 }
 0xa22   :  { %2494 = vmatprep.subr.mxu1 %v2717_v13 }
 0xa23   :  { %2495 = vmatpush3.msra.mxu1 %v2976_v53 }
 0xa24   :  { %2496 = vmatprep.subr.mxu1 %v2717_v13 }
 0xa25   :  { %2497 = vmatpush3.msra.mxu1 %v2980_v54 }
 0xa26   :  { %2498 = vmatprep.subr.mxu1 %v2717_v13  ;;  %v1930_v13 = vld [vmem:[%s3179_s7 + $0x18] sm:$0xff] }
 0xa27   :  { %2499 = vmatpush3.msra.mxu1 %v2984_v55  ;;  %v1929_v55 = vld [vmem:[%s3179_s7 + $0x10] sm:$0xff]  ;;  %2503 = vmatprep.subr.mxu0 %v1930_v13 }
 0xae0   :  { %v1622_v50 = vpop.f32.mrf.mxu1 }
 0xae1   :  { %v1626_v51 = vadd.f32 %v1622_v50, %v1552_v49 }
 0xae2   :  { %v2480_v56 = vpop.f32.mrf.mxu1 }
 0xae3   :  { %2585 = vtanh.f32 %v1626_v51 }
 0xaf0   :  { %v2586_v52 = vpop.eup %2585 }
 0xaf1   :  { %1628 = vst.msk [vmem:[#allocation3 + $0x28] sm:$0xff] %vm371_vm2, %v2586_v52  ;;  %2490 = vmatmul.mubr.msk.f32.vlgmr.msra.gmra.mxu0 %vm371_vm2, %v2586_v52 }
 0xaf2   :  { %2504 = vmatpush3.msra.mxu0 %v1930_v13 }
 0xaf3   :  { %2505 = vmatprep.subr.mxu0 %v1929_v55 }
 0xaf4   :  { %2506 = vmatpush3.msra.mxu0 %v1929_v55 }
 0xaf5   :  { %2507 = vmatprep.subr.mxu0 %v1928_v60 }
 0xaf6   :  { %2508 = vmatpush3.msra.mxu0 %v1928_v60 }
 0xaf7   :  { %2509 = vmatprep.subr.mxu0 %v1927_v61 }
 0xaf8   :  { %2510 = vmatpush3.msra.mxu0 %v1927_v61 }
 0xbb1   :  { %v1699_v53 = vpop.f32.mrf.mxu0 }
 0xbb2   :  { %v1703_v58 = vadd.f32 %v1699_v53, %v1629_v57 }
 0xbb3   :  { %v2491_v59 = vpop.f32.mrf.mxu0 }
 0xbb4   :  { %2587 = vtanh.f32 %v1703_v58 }
 0xbc1   :  { %v2588_v54 = vpop.eup %2587 }
 0xbc2   :  { %1705 = vst.msk [vmem:[#allocation3 + $0x30] sm:$0xff] %vm371_vm2, %v2588_v54  ;;  %2501 = vmatmul.mubr.msk.f32.vlgmr.msra.gmra.mxu1 %vm371_vm2, %v2588_v54 }
 0xbc9   :  { %v2551_v6 = vld [vmem:[#allocation3 + $0x20] ss:$16 sps:$4 sm:$0xff]   ;;  %v2557_v9 = vld [vmem:[#allocation3 + $0x24] ss:$16 sps:$4 sm:$0xff]  }
 0xbca   :  { %v1831_v15 = vrot.slane %v2551_v6, %v2781_v8  ;;  %v1838_v24 = vrot.slane %v2557_v9, %v2781_v8 }
 0xc82   :  { %v1776_v63 = vpop.f32.mrf.mxu1 }
 0xc83   :  { %v1780_v0 = vadd.f32 %v1776_v63, %v1706_v62 }
 0xc84   :  { %v2502_v1 = vpop.f32.mrf.mxu1 }
 0xc85   :  { %2589 = vtanh.f32 %v1780_v0 }
 0xc92   :  { %v2590_v2 = vpop.eup %2589 }
 0xc93   :  { %1782 = vst.msk [vmem:[#allocation3 + $0x38] sm:$0xff] %vm371_vm2, %v2590_v2 }
 0xc9a   :  { %v2553_v11 = vld [vmem:[#allocation3 + $0x28] ss:$16 sps:$4 sm:$0xff]   ;;  %v2558_v12 = vld [vmem:[#allocation3 + $0x2c] ss:$16 sps:$4 sm:$0xff]  }
 0xc9b   :  { %v1847_v16 = vrot.slane %v2553_v11, %v2781_v8  ;;  %v1854_v18 = vrot.slane %v2558_v12, %v2781_v8  ;;  %v1879_v8 = vrot.slane %v1871_v33, %v2794_v20 }
 0xc9d   :  { %v1887_v21 = vcombine.low %v1831_v15, %v1847_v16  ;;  %v1888_v23 = vcombine.high %v1831_v15, %v1847_v16  ;;  %v1903_v29 = vcombine.low %v1838_v24, %v1854_v18  ;;  %v1904_v36 = vcombine.high %v1838_v24, %v1854_v18 }
 0xc9f   :  { %v1895_v27 = vrot.slane %v1887_v21, %v2794_v20  ;;  %v1902_v28 = vrot.slane %v1888_v23, %v2794_v20  ;;  %v1911_v35 = vrot.slane %v1903_v29, %v2794_v20  ;;  %v1918_v40 = vrot.slane %v1904_v36, %v2794_v20 }
 0xca1   :  { %v1919_v30 = vcombine.low %v1863_v26, %v1895_v27  ;;  %v1920_v31 = vcombine.high %v1863_v26, %v1895_v27  ;;  %v1921_v34 = vcombine.low %v1870_v32, %v1902_v28  ;;  %v1922_v38 = vcombine.high %v1870_v32, %v1902_v28 }
 0xca2   :  { %v1923_v39 = vcombine.low %v1879_v8, %v1911_v35  ;;  %v1924_v42 = vcombine.high %v1879_v8, %v1911_v35  ;;  %v1925_v43 = vcombine.low %v1886_v41, %v1918_v40  ;;  %v1926_v44 = vcombine.high %v1886_v41, %v1918_v40 }
 0xca3   :  { %2511 = vmatprep.mubr.msk.f32.mxu0 %vm371_vm2, %v1919_v30 }
 0xca4   :  { %2512 = vmatmul.mubr.msk.f32.vlgmr.msra.gmra.mxu0 %vm371_vm2, %v1920_v31 }
 0xca5   :  { %2514 = vmatprep.mubr.msk.f32.mxu0 %vm371_vm2, %v1921_v34 }
 0xca8   :  { %2515 = vmatmul.mubr.msk.f32.gmra.mxu0 %vm371_vm2, %v1922_v38 }
 0xca9   :  { %2517 = vmatprep.mubr.msk.f32.mxu0 %vm371_vm2, %v1923_v39 }
 0xcac   :  { %2518 = vmatmul.mubr.msk.f32.gmra.mxu0 %vm371_vm2, %v1924_v42 }
 0xcad   :  { %2520 = vmatprep.mubr.msk.f32.mxu0 %vm371_vm2, %v1925_v43 }
 0xcb0   :  { %2521 = vmatmul.mubr.msk.f32.gmra.mxu0 %vm371_vm2, %v1926_v44 }
 0xd64   :  { %v2513_v46 = vpop.f32.mrf.mxu0 }
 0xd65   :  { %v2034_v47 = vadd.f32 %v2513_v46, %v2163_v45 }
 0xd66   :  { %v2028_v48 = vpop.f32.mrf.mxu0 }
 0xd67   :  { %v2173_v49 = vmul.f32 -1.442695, %v2034_v47  ;;  %v2029_v50 = vadd.f32 %v2163_v45, %v2028_v48 }
 0xd68   :  { %v2516_v51 = vpop.f32.mrf.mxu0 }
 0xd69   :  { %2591 = vpow2.f32 %v2173_v49  ;;  %v2172_v20 = vmul.f32 -1.442695, %v2029_v50  ;;  %v2044_v56 = vadd.f32 %v2516_v51, %v2163_v45 }
 0xd6a   :  { %v2038_v52 = vpop.f32.mrf.mxu0 }
 0xd6b   :  { %2593 = vpow2.f32 %v2172_v20  ;;  %v2175_v57 = vmul.f32 -1.442695, %v2044_v56  ;;  %v2039_v53 = vadd.f32 %v2163_v45, %v2038_v52 }
 0xd6c   :  { %v2519_v58 = vpop.f32.mrf.mxu0 }
 0xd6d   :  { %2595 = vpow2.f32 %v2175_v57  ;;  %v2174_v59 = vmul.f32 -1.442695, %v2039_v53  ;;  %v2054_v54 = vadd.f32 %v2519_v58, %v2163_v45 }
 0xd6e   :  { %v2048_v13 = vpop.f32.mrf.mxu0 }
 0xd6f   :  { %2597 = vpow2.f32 %v2174_v59  ;;  %v2177_v55 = vmul.f32 -1.442695, %v2054_v54  ;;  %v2049_v60 = vadd.f32 %v2163_v45, %v2048_v13 }
 0xd70   :  { %v2522_v61 = vpop.f32.mrf.mxu0 }
 0xd71   :  { %2599 = vpow2.f32 %v2177_v55  ;;  %v2176_v62 = vmul.f32 -1.442695, %v2049_v60  ;;  %v2064_v63 = vadd.f32 %v2522_v61, %v2163_v45 }
 0xd72   :  { %v2058_v0 = vpop.f32.mrf.mxu0 }
 0xd73   :  { %2601 = vpow2.f32 %v2176_v62  ;;  %v2179_v1 = vmul.f32 -1.442695, %v2064_v63  ;;  %v2059_v2 = vadd.f32 %v2163_v45, %v2058_v0 }
 0xd75   :  { %2603 = vpow2.f32 %v2179_v1  ;;  %v2178_v3 = vmul.f32 -1.442695, %v2059_v2 }
 0xd76   :  { %v2592_v4 = vpop.eup %2591 }
 0xd77   :  { %v2092_v5 = vadd.f32 1.0, %v2592_v4  ;;  %2605 = vpow2.f32 %v2178_v3 }
 0xd78   :  { %v2594_v6 = vpop.eup %2593 }
 0xd79   :  { %2607 = vrcp.f32 %v2092_v5  ;;  %v2091_v7 = vadd.f32 1.0, %v2594_v6 }
 0xd7a   :  { %v2596_v9 = vpop.eup %2595 }
 0xd7b   :  { %2609 = vrcp.f32 %v2091_v7  ;;  %v2094_v10 = vadd.f32 1.0, %v2596_v9 }
 0xd7c   :  { %v2598_v11 = vpop.eup %2597 }
 0xd7d   :  { %2611 = vrcp.f32 %v2094_v10  ;;  %v2093_v12 = vadd.f32 1.0, %v2598_v11 }
 0xd7e   :  { %v2600_v14 = vpop.eup %2599 }
 0xd7f   :  { %2613 = vrcp.f32 %v2093_v12  ;;  %v2096_v15 = vadd.f32 1.0, %v2600_v14 }
 0xd80   :  { %v2602_v16 = vpop.eup %2601 }
 0xd81   :  { %2615 = vrcp.f32 %v2096_v15  ;;  %v2095_v17 = vadd.f32 1.0, %v2602_v16 }
 0xd82   :  { %v2604_v18 = vpop.eup %2603 }
 0xd83   :  { %2617 = vrcp.f32 %v2095_v17  ;;  %v2098_v19 = vadd.f32 1.0, %v2604_v18 }
 0xd84   :  { %v2606_v21 = vpop.eup %2605 }
 0xd85   :  { %2619 = vrcp.f32 %v2098_v19  ;;  %v2097_v22 = vadd.f32 1.0, %v2606_v21 }
 0xd86   :  { %v2608_v23 = vpop.eup %2607 }
 0xd87   :  { %2117 = vst.msk [vmem:[%s3181_s9 + $0x8] sm:$0xff] %vm2115_vm3, %v2608_v23  ;;  %2621 = vrcp.f32 %v2097_v22 }
 0xd88   :  { %v2610_v24 = vpop.eup %2609 }
 0xd89   :  { %2116 = vst.msk [vmem:[%s3181_s9] sm:$0xff] %vm2115_vm3, %v2610_v24 }
 0xd8a   :  { %v2612_v25 = vpop.eup %2611 }
 0xd8b   :  { %2119 = vst.msk [vmem:[%s3181_s9 + $0x18] sm:$0xff] %vm2115_vm3, %v2612_v25 }
 0xd8c   :  { %v2614_v26 = vpop.eup %2613 }
 0xd8d   :  { %2118 = vst.msk [vmem:[%s3181_s9 + $0x10] sm:$0xff] %vm2115_vm3, %v2614_v26 }
 0xd8e   :  { %v2616_v27 = vpop.eup %2615 }
 0xd8f   :  { %2121 = vst.msk [vmem:[%s3181_s9 + $0x28] sm:$0xff] %vm2115_vm3, %v2616_v27 }
 0xd90   :  { %v2618_v28 = vpop.eup %2617 }
 0xd91   :  { %2120 = vst.msk [vmem:[%s3181_s9 + $0x20] sm:$0xff] %vm2115_vm3, %v2618_v28 }
 0xd92   :  { %v2620_v29 = vpop.eup %2619 }
 0xd93   :  { %2123 = vst.msk [vmem:[%s3181_s9 + $0x38] sm:$0xff] %vm2115_vm3, %v2620_v29 }
 0xd94   :  { %v2622_v30 = vpop.eup %2621 }
 0xd95   :  { %2122 = vst.msk [vmem:[%s3181_s9 + $0x30] sm:$0xff] %vm2115_vm3, %v2622_v30 }
 0xd96   :  { %2128 = vsyncpa [#allocation5], 1 }
 0xd97   :  { %2129 = vsyncpa [#allocation7], 1 }
 0xd98   :  { %2130 = vsyncpa [#allocation10], 1 }

</bundles_post_ra>
